<compile_context>
chip_gen: v5e
topology: v5e:2x2
jax: 0.10.0
libtpu: 0.0.40
codegen_flags: <defaults>
</compile_context>

<pallas_src>
import functools

import jax
import jax.numpy as jnp
from jax import lax
from jax.experimental import pallas as pl
from jax.experimental.pallas import tpu as pltpu


# -----------------------------------------------------------------------------
# Fused kernel: all LSTM layers + final linear in one pallas_call.
#
# Positional refs (per grid step over batch blocks):
#   x_ref                                   : (seq, Bb, input_dim)   time-major
#   [wih_l (in_l, 4H), whh_l (H, 4H), b_l (1, 4H)]  for l in range(n_layers)
#   wlin_ref (H, OUT_PAD), blin_ref (1, OUT_PAD)
#   out_ref  (fwindow, Bb, OUT_PAD)
#
# Gate order matches PyTorch: [i | f | g | o] packed along the 4H lane axis.
# whh_l = W_hh^T so that h @ whh_l yields the packed gate pre-activations.
# -----------------------------------------------------------------------------
def _make_fused_kernel(n_layers, seq, fwindow, hidden, out_pad):
    H = hidden

    def kernel(*refs):
        x_ref = refs[0]
        layer_refs = refs[1:1 + 3 * n_layers]
        wlin_ref = refs[1 + 3 * n_layers]
        blin_ref = refs[2 + 3 * n_layers]
        out_ref = refs[3 + 3 * n_layers]

        B = x_ref.shape[1]                               # batch block size
        x = x_ref[...]                                   # (seq, B, in_dim)
        layer_in = x.reshape(seq * B, x.shape[-1])       # (seq*B, in_dim)

        hs = None
        for l in range(n_layers):
            wih = layer_refs[3 * l + 0][...]             # (in_l, 4H)
            whh = layer_refs[3 * l + 1][...]             # (H, 4H), read once/layer
            bias = layer_refs[3 * l + 2][...]            # (1, 4H)

            # Hoisted input projection: one matmul for the whole sequence,
            # kept packed (no per-gate lane slicing here).
            gx = (jnp.dot(layer_in, wih, preferred_element_type=jnp.float32)
                  + bias).reshape(seq, B, 4 * H)         # (seq, B, 4H)

            h = None
            c = None
            hs = []
            for t in range(seq):                         # fully unrolled (seq=8)
                if t == 0:
                    gates = gx[0]                        # h0 = c0 = 0
                else:
                    # Single fused recurrent dot: (B,H) @ (H,4H=128 lanes).
                    gates = gx[t] + jnp.dot(
                        h, whh, preferred_element_type=jnp.float32)
                # Activations on the full packed 128-lane vreg, then slice.
                sig = jax.nn.sigmoid(gates)
                tan = jnp.tanh(gates)
                i_g = sig[:, 0 * H:1 * H]
                f_g = sig[:, 1 * H:2 * H]
                g_g = tan[:, 2 * H:3 * H]
                o_g = sig[:, 3 * H:4 * H]
                c = i_g * g_g if t == 0 else f_g * c + i_g * g_g
                h = o_g * jnp.tanh(c)
                hs.append(h)                             # stays in vregs

            layer_in = jnp.concatenate(hs, axis=0)       # (seq*B, H) next layer

        # Fused final linear on the last `fwindow` timesteps, lane-dense
        # (out_dim zero-padded to OUT_PAD=128 lanes in the wrapper).
        tail = jnp.concatenate(hs[seq - fwindow:], axis=0)       # (fwindow*B, H)
        pred = (jnp.dot(tail, wlin_ref[...],
                        preferred_element_type=jnp.float32)
                + blin_ref[...])                                 # (fwindow*B, OUT_PAD)
        out_ref[...] = pred.reshape(fwindow, B, out_pad)

    return kernel


# -----------------------------------------------------------------------------
# Parameter init (deterministic, PyTorch-style uniform(-1/sqrt(H), 1/sqrt(H))).
# -----------------------------------------------------------------------------
def init_params(key, input_dim, output_dim, hidden, n_layers):
    k = 1.0 / float(jnp.sqrt(hidden))
    params = {"lstm": []}
    for layer in range(n_layers):
        in_dim = input_dim if layer == 0 else hidden
        key, k1, k2, k3, k4 = jax.random.split(key, 5)
        wih = jax.random.uniform(k1, (4 * hidden, in_dim), jnp.float32, -k, k)
        whh = jax.random.uniform(k2, (4 * hidden, hidden), jnp.float32, -k, k)
        bih = jax.random.uniform(k3, (4 * hidden,), jnp.float32, -k, k)
        bhh = jax.random.uniform(k4, (4 * hidden,), jnp.float32, -k, k)
        params["lstm"].append((wih, whh, bih, bhh))
    key, k5, k6 = jax.random.split(key, 3)
    params["w_lin"] = jax.random.uniform(k5, (output_dim, hidden), jnp.float32, -k, k)
    params["b_lin"] = jax.random.uniform(k6, (output_dim,), jnp.float32, -k, k)
    return params


# -----------------------------------------------------------------------------
# Forward pass equivalent to LSTMLinear.forward.
#   x: (batch, seq, input_dim)  ->  (batch, fwindow, output_dim)
# -----------------------------------------------------------------------------
def lstm_linear_forward(params, x, fwindow, batch_block=8):
    batch, seq, in_dim = x.shape
    assert seq >= fwindow, "sequence must be at least fwindow long"
    n_layers = len(params["lstm"])
    H = params["lstm"][0][1].shape[1]            # whh: (4H, H)
    out_dim = params["w_lin"].shape[0]
    OUT_PAD = 128                                # lane-dense output slab width

    # Pad batch to a multiple of the batch block (>= 8 sublanes); padded rows
    # are independent dead work and are sliced off below.
    batch_block = max(8, ((batch_block + 7) // 8) * 8)
    B = max(batch_block, ((batch + batch_block - 1) // batch_block) * batch_block)
    num_blocks = B // batch_block

    x_tm = jnp.transpose(x, (1, 0, 2)).astype(jnp.float32)   # (seq, batch, in)
    if B != batch:
        x_tm = jnp.pad(x_tm, ((0, 0), (0, B - batch), (0, 0)))

    inputs = [x_tm]
    in_specs = [pl.BlockSpec((seq, batch_block, in_dim), lambda b: (0, b, 0))]
    for (wih, whh, bih, bhh) in params["lstm"]:
        wih_t = jnp.transpose(wih)                            # (in_dim, 4H)
        whh_t = jnp.transpose(whh)                            # (H, 4H) packed i|f|g|o
        bias = (bih + bhh)[None, :]                           # (1, 4H)
        inputs += [wih_t, whh_t, bias]
        in_specs += [
            pl.BlockSpec(wih_t.shape, lambda b: (0, 0)),      # weights stay resident
            pl.BlockSpec(whh_t.shape, lambda b: (0, 0)),
            pl.BlockSpec(bias.shape, lambda b: (0, 0)),
        ]
    # Final linear, zero-padded to a lane-dense 128-wide output slab.
    w_lin_pad = jnp.zeros((H, OUT_PAD), jnp.float32)
    w_lin_pad = w_lin_pad.at[:, :out_dim].set(jnp.transpose(params["w_lin"]))
    b_lin_pad = jnp.zeros((1, OUT_PAD), jnp.float32)
    b_lin_pad = b_lin_pad.at[:, :out_dim].set(params["b_lin"][None, :])
    inputs += [w_lin_pad, b_lin_pad]
    in_specs += [pl.BlockSpec((H, OUT_PAD), lambda b: (0, 0)),
                 pl.BlockSpec((1, OUT_PAD), lambda b: (0, 0))]

    kernel = _make_fused_kernel(n_layers, seq, fwindow, H, OUT_PAD)
    out = pl.pallas_call(
        kernel,
        out_shape=jax.ShapeDtypeStruct((fwindow, B, OUT_PAD), jnp.float32),
        grid=(num_blocks,),
        in_specs=in_specs,
        out_specs=pl.BlockSpec((fwindow, batch_block, OUT_PAD),
                               lambda b: (0, b, 0)),
        compiler_params=pltpu.CompilerParams(
            dimension_semantics=("parallel",)),
    )(*inputs)

    out = out[:, :batch, :out_dim]                            # drop pads
    return jnp.transpose(out, (1, 0, 2))                      # (batch, fwindow, out)


# Pure-JAX reference (lax.scan) for numerical verification.
def reference_forward(params, x, fwindow):
    h_seq = jnp.transpose(x, (1, 0, 2)).astype(jnp.float32)
    for (wih, whh, bih, bhh) in params["lstm"]:
        H = whh.shape[1]
        batch = h_seq.shape[1]

        def step(carry, x_t):
            h, c = carry
            gates = x_t @ wih.T + h @ whh.T + bih + bhh
            i = jax.nn.sigmoid(gates[:, :H])
            f = jax.nn.sigmoid(gates[:, H:2 * H])
            g = jnp.tanh(gates[:, 2 * H:3 * H])
            o = jax.nn.sigmoid(gates[:, 3 * H:])
            c = f * c + i * g
            h = o * jnp.tanh(c)
            return (h, c), h

        init = (jnp.zeros((batch, H), jnp.float32),
                jnp.zeros((batch, H), jnp.float32))
        _, h_seq = lax.scan(step, init, h_seq)
    out = h_seq[-fwindow:]
    pred = out @ params["w_lin"].T + params["b_lin"]
    return jnp.transpose(pred, (1, 0, 2))


if __name__ == "__main__":
    # Small shapes consistent with the module.
    batch, seq, input_dim = 2, 8, 4
    hidden, n_layers, output_dim = 32, 2, 3
    seqlen_target = 1  # fwindow

    key = jax.random.PRNGKey(0)
    key, pkey, xkey = jax.random.split(key, 3)
    params = init_params(pkey, input_dim, output_dim, hidden, n_layers)
    x = jax.random.normal(xkey, (batch, seq, input_dim), jnp.float32)

    fwd = jax.jit(functools.partial(lstm_linear_forward, fwindow=seqlen_target))
    pred = jax.block_until_ready(fwd(params, x))

    ref = jax.block_until_ready(reference_forward(params, x, seqlen_target))
    assert pred.shape == (batch, seqlen_target, output_dim), pred.shape
    assert jnp.allclose(pred, ref, atol=1e-5, rtol=1e-5), (pred, ref)

    print("KERNEL_OK")
</pallas_src>

<mosaic_0001>
module attributes {stable_mosaic.version = 11 : i64} {
  func.func @kernel(%arg0: i32, %arg1: memref<8x8x4xf32, #tpu.memory_space<vmem>>, %arg2: memref<4x128xf32, #tpu.memory_space<vmem>>, %arg3: memref<32x128xf32, #tpu.memory_space<vmem>>, %arg4: memref<1x128xf32, #tpu.memory_space<vmem>>, %arg5: memref<32x128xf32, #tpu.memory_space<vmem>>, %arg6: memref<32x128xf32, #tpu.memory_space<vmem>>, %arg7: memref<1x128xf32, #tpu.memory_space<vmem>>, %arg8: memref<32x128xf32, #tpu.memory_space<vmem>>, %arg9: memref<1x128xf32, #tpu.memory_space<vmem>>, %arg10: memref<1x8x128xf32, #tpu.memory_space<vmem>>) attributes {dimension_semantics = [#tpu.dimension_semantics<parallel>], iteration_bounds = array<i64: 1>, scalar_prefetch = 0 : i64, scratch_operands = 0 : i64, tpu.core_type = #tpu.core_type<tc>, window_params = [{transform_indices = @transform_0, window_bounds = array<i64: 8, 8, 4>}, {pipeline_mode = #tpu.pipeline_mode<synchronous>, transform_indices = @transform_1, window_bounds = array<i64: 4, 128>}, {pipeline_mode = #tpu.pipeline_mode<synchronous>, transform_indices = @transform_2, window_bounds = array<i64: 32, 128>}, {pipeline_mode = #tpu.pipeline_mode<synchronous>, transform_indices = @transform_3, window_bounds = array<i64: 1, 128>}, {pipeline_mode = #tpu.pipeline_mode<synchronous>, transform_indices = @transform_4, window_bounds = array<i64: 32, 128>}, {pipeline_mode = #tpu.pipeline_mode<synchronous>, transform_indices = @transform_5, window_bounds = array<i64: 32, 128>}, {pipeline_mode = #tpu.pipeline_mode<synchronous>, transform_indices = @transform_6, window_bounds = array<i64: 1, 128>}, {pipeline_mode = #tpu.pipeline_mode<synchronous>, transform_indices = @transform_7, window_bounds = array<i64: 32, 128>}, {pipeline_mode = #tpu.pipeline_mode<synchronous>, transform_indices = @transform_8, window_bounds = array<i64: 1, 128>}, {transform_indices = @transform_9, window_bounds = array<i64: 1, 8, 128>}]} {
    %c0 = arith.constant 0 : index
    %c0_0 = arith.constant 0 : index
    %c0_1 = arith.constant 0 : index
    %0 = vector.load %arg1[%c0, %c0_0, %c0_1] : memref<8x8x4xf32, #tpu.memory_space<vmem>>, vector<8x8x4xf32>
    %1 = vector.shape_cast %0 : vector<8x8x4xf32> to vector<64x4xf32>
    %c0_2 = arith.constant 0 : index
    %c0_3 = arith.constant 0 : index
    %2 = vector.load %arg2[%c0_2, %c0_3] : memref<4x128xf32, #tpu.memory_space<vmem>>, vector<4x128xf32>
    %c0_4 = arith.constant 0 : index
    %c0_5 = arith.constant 0 : index
    %3 = vector.load %arg3[%c0_4, %c0_5] : memref<32x128xf32, #tpu.memory_space<vmem>>, vector<32x128xf32>
    %c0_6 = arith.constant 0 : index
    %c0_7 = arith.constant 0 : index
    %4 = vector.load %arg4[%c0_6, %c0_7] : memref<1x128xf32, #tpu.memory_space<vmem>>, vector<1x128xf32>
    %cst = arith.constant dense<0.000000e+00> : vector<64x128xf32>
    %5 = tpu.matmul %1, %2, %cst {dimension_numbers = #tpu.dot_dimension_numbers<[1], [0], [0], [1], [0, 0, 1, 1], [], []>} : vector<64x4xf32>, vector<4x128xf32>, vector<64x128xf32> -> vector<64x128xf32>
    %6 = vector.broadcast %4 : vector<1x128xf32> to vector<64x128xf32>
    %7 = arith.addf %5, %6 : vector<64x128xf32>
    %8 = vector.shape_cast %7 : vector<64x128xf32> to vector<8x8x128xf32>
    %9 = vector.extract_strided_slice %8 {offsets = [0, 0, 0], sizes = [1, 8, 128], strides = [1, 1, 1]} : vector<8x8x128xf32> to vector<1x8x128xf32>
    %10 = vector.shape_cast %9 : vector<1x8x128xf32> to vector<8x128xf32>
    %11 = arith.negf %10 : vector<8x128xf32>
    %12 = math.exp %11 : vector<8x128xf32>
    %cst_8 = arith.constant 1.000000e+00 : f32
    %13 = vector.broadcast %cst_8 : f32 to vector<8x128xf32>
    %14 = arith.addf %13, %12 : vector<8x128xf32>
    %15 = arith.divf %13, %14 : vector<8x128xf32>
    %16 = math.tanh %10 : vector<8x128xf32>
    %17 = vector.extract_strided_slice %15 {offsets = [0, 0], sizes = [8, 32], strides = [1, 1]} : vector<8x128xf32> to vector<8x32xf32>
    %18 = vector.extract_strided_slice %16 {offsets = [0, 64], sizes = [8, 32], strides = [1, 1]} : vector<8x128xf32> to vector<8x32xf32>
    %19 = vector.extract_strided_slice %15 {offsets = [0, 96], sizes = [8, 32], strides = [1, 1]} : vector<8x128xf32> to vector<8x32xf32>
    %20 = arith.mulf %17, %18 : vector<8x32xf32>
    %21 = math.tanh %20 : vector<8x32xf32>
    %22 = arith.mulf %19, %21 : vector<8x32xf32>
    %23 = vector.extract_strided_slice %8 {offsets = [1, 0, 0], sizes = [1, 8, 128], strides = [1, 1, 1]} : vector<8x8x128xf32> to vector<1x8x128xf32>
    %24 = vector.shape_cast %23 : vector<1x8x128xf32> to vector<8x128xf32>
    %cst_9 = arith.constant dense<0.000000e+00> : vector<8x128xf32>
    %25 = tpu.matmul %22, %3, %cst_9 {dimension_numbers = #tpu.dot_dimension_numbers<[1], [0], [0], [1], [0, 0, 1, 1], [], []>} : vector<8x32xf32>, vector<32x128xf32>, vector<8x128xf32> -> vector<8x128xf32>
    %26 = arith.addf %24, %25 : vector<8x128xf32>
    %27 = arith.negf %26 : vector<8x128xf32>
    %28 = math.exp %27 : vector<8x128xf32>
    %cst_10 = arith.constant 1.000000e+00 : f32
    %29 = vector.broadcast %cst_10 : f32 to vector<8x128xf32>
    %30 = arith.addf %29, %28 : vector<8x128xf32>
    %31 = arith.divf %29, %30 : vector<8x128xf32>
    %32 = math.tanh %26 : vector<8x128xf32>
    %33 = vector.extract_strided_slice %31 {offsets = [0, 0], sizes = [8, 32], strides = [1, 1]} : vector<8x128xf32> to vector<8x32xf32>
    %34 = vector.extract_strided_slice %31 {offsets = [0, 32], sizes = [8, 32], strides = [1, 1]} : vector<8x128xf32> to vector<8x32xf32>
    %35 = vector.extract_strided_slice %32 {offsets = [0, 64], sizes = [8, 32], strides = [1, 1]} : vector<8x128xf32> to vector<8x32xf32>
    %36 = vector.extract_strided_slice %31 {offsets = [0, 96], sizes = [8, 32], strides = [1, 1]} : vector<8x128xf32> to vector<8x32xf32>
    %37 = arith.mulf %34, %20 : vector<8x32xf32>
    %38 = arith.mulf %33, %35 : vector<8x32xf32>
    %39 = arith.addf %37, %38 : vector<8x32xf32>
    %40 = math.tanh %39 : vector<8x32xf32>
    %41 = arith.mulf %36, %40 : vector<8x32xf32>
    %42 = vector.extract_strided_slice %8 {offsets = [2, 0, 0], sizes = [1, 8, 128], strides = [1, 1, 1]} : vector<8x8x128xf32> to vector<1x8x128xf32>
    %43 = vector.shape_cast %42 : vector<1x8x128xf32> to vector<8x128xf32>
    %cst_11 = arith.constant dense<0.000000e+00> : vector<8x128xf32>
    %44 = tpu.matmul %41, %3, %cst_11 {dimension_numbers = #tpu.dot_dimension_numbers<[1], [0], [0], [1], [0, 0, 1, 1], [], []>} : vector<8x32xf32>, vector<32x128xf32>, vector<8x128xf32> -> vector<8x128xf32>
    %45 = arith.addf %43, %44 : vector<8x128xf32>
    %46 = arith.negf %45 : vector<8x128xf32>
    %47 = math.exp %46 : vector<8x128xf32>
    %cst_12 = arith.constant 1.000000e+00 : f32
    %48 = vector.broadcast %cst_12 : f32 to vector<8x128xf32>
    %49 = arith.addf %48, %47 : vector<8x128xf32>
    %50 = arith.divf %48, %49 : vector<8x128xf32>
    %51 = math.tanh %45 : vector<8x128xf32>
    %52 = vector.extract_strided_slice %50 {offsets = [0, 0], sizes = [8, 32], strides = [1, 1]} : vector<8x128xf32> to vector<8x32xf32>
    %53 = vector.extract_strided_slice %50 {offsets = [0, 32], sizes = [8, 32], strides = [1, 1]} : vector<8x128xf32> to vector<8x32xf32>
    %54 = vector.extract_strided_slice %51 {offsets = [0, 64], sizes = [8, 32], strides = [1, 1]} : vector<8x128xf32> to vector<8x32xf32>
    %55 = vector.extract_strided_slice %50 {offsets = [0, 96], sizes = [8, 32], strides = [1, 1]} : vector<8x128xf32> to vector<8x32xf32>
    %56 = arith.mulf %53, %39 : vector<8x32xf32>
    %57 = arith.mulf %52, %54 : vector<8x32xf32>
    %58 = arith.addf %56, %57 : vector<8x32xf32>
    %59 = math.tanh %58 : vector<8x32xf32>
    %60 = arith.mulf %55, %59 : vector<8x32xf32>
    %61 = vector.extract_strided_slice %8 {offsets = [3, 0, 0], sizes = [1, 8, 128], strides = [1, 1, 1]} : vector<8x8x128xf32> to vector<1x8x128xf32>
    %62 = vector.shape_cast %61 : vector<1x8x128xf32> to vector<8x128xf32>
    %cst_13 = arith.constant dense<0.000000e+00> : vector<8x128xf32>
    %63 = tpu.matmul %60, %3, %cst_13 {dimension_numbers = #tpu.dot_dimension_numbers<[1], [0], [0], [1], [0, 0, 1, 1], [], []>} : vector<8x32xf32>, vector<32x128xf32>, vector<8x128xf32> -> vector<8x128xf32>
    %64 = arith.addf %62, %63 : vector<8x128xf32>
    %65 = arith.negf %64 : vector<8x128xf32>
    %66 = math.exp %65 : vector<8x128xf32>
    %cst_14 = arith.constant 1.000000e+00 : f32
    %67 = vector.broadcast %cst_14 : f32 to vector<8x128xf32>
    %68 = arith.addf %67, %66 : vector<8x128xf32>
    %69 = arith.divf %67, %68 : vector<8x128xf32>
    %70 = math.tanh %64 : vector<8x128xf32>
    %71 = vector.extract_strided_slice %69 {offsets = [0, 0], sizes = [8, 32], strides = [1, 1]} : vector<8x128xf32> to vector<8x32xf32>
    %72 = vector.extract_strided_slice %69 {offsets = [0, 32], sizes = [8, 32], strides = [1, 1]} : vector<8x128xf32> to vector<8x32xf32>
    %73 = vector.extract_strided_slice %70 {offsets = [0, 64], sizes = [8, 32], strides = [1, 1]} : vector<8x128xf32> to vector<8x32xf32>
    %74 = vector.extract_strided_slice %69 {offsets = [0, 96], sizes = [8, 32], strides = [1, 1]} : vector<8x128xf32> to vector<8x32xf32>
    %75 = arith.mulf %72, %58 : vector<8x32xf32>
    %76 = arith.mulf %71, %73 : vector<8x32xf32>
    %77 = arith.addf %75, %76 : vector<8x32xf32>
    %78 = math.tanh %77 : vector<8x32xf32>
    %79 = arith.mulf %74, %78 : vector<8x32xf32>
    %80 = vector.extract_strided_slice %8 {offsets = [4, 0, 0], sizes = [1, 8, 128], strides = [1, 1, 1]} : vector<8x8x128xf32> to vector<1x8x128xf32>
    %81 = vector.shape_cast %80 : vector<1x8x128xf32> to vector<8x128xf32>
    %cst_15 = arith.constant dense<0.000000e+00> : vector<8x128xf32>
    %82 = tpu.matmul %79, %3, %cst_15 {dimension_numbers = #tpu.dot_dimension_numbers<[1], [0], [0], [1], [0, 0, 1, 1], [], []>} : vector<8x32xf32>, vector<32x128xf32>, vector<8x128xf32> -> vector<8x128xf32>
    %83 = arith.addf %81, %82 : vector<8x128xf32>
    %84 = arith.negf %83 : vector<8x128xf32>
    %85 = math.exp %84 : vector<8x128xf32>
    %cst_16 = arith.constant 1.000000e+00 : f32
    %86 = vector.broadcast %cst_16 : f32 to vector<8x128xf32>
    %87 = arith.addf %86, %85 : vector<8x128xf32>
    %88 = arith.divf %86, %87 : vector<8x128xf32>
    %89 = math.tanh %83 : vector<8x128xf32>
    %90 = vector.extract_strided_slice %88 {offsets = [0, 0], sizes = [8, 32], strides = [1, 1]} : vector<8x128xf32> to vector<8x32xf32>
    %91 = vector.extract_strided_slice %88 {offsets = [0, 32], sizes = [8, 32], strides = [1, 1]} : vector<8x128xf32> to vector<8x32xf32>
    %92 = vector.extract_strided_slice %89 {offsets = [0, 64], sizes = [8, 32], strides = [1, 1]} : vector<8x128xf32> to vector<8x32xf32>
    %93 = vector.extract_strided_slice %88 {offsets = [0, 96], sizes = [8, 32], strides = [1, 1]} : vector<8x128xf32> to vector<8x32xf32>
    %94 = arith.mulf %91, %77 : vector<8x32xf32>
    %95 = arith.mulf %90, %92 : vector<8x32xf32>
    %96 = arith.addf %94, %95 : vector<8x32xf32>
    %97 = math.tanh %96 : vector<8x32xf32>
    %98 = arith.mulf %93, %97 : vector<8x32xf32>
    %99 = vector.extract_strided_slice %8 {offsets = [5, 0, 0], sizes = [1, 8, 128], strides = [1, 1, 1]} : vector<8x8x128xf32> to vector<1x8x128xf32>
    %100 = vector.shape_cast %99 : vector<1x8x128xf32> to vector<8x128xf32>
    %cst_17 = arith.constant dense<0.000000e+00> : vector<8x128xf32>
    %101 = tpu.matmul %98, %3, %cst_17 {dimension_numbers = #tpu.dot_dimension_numbers<[1], [0], [0], [1], [0, 0, 1, 1], [], []>} : vector<8x32xf32>, vector<32x128xf32>, vector<8x128xf32> -> vector<8x128xf32>
    %102 = arith.addf %100, %101 : vector<8x128xf32>
    %103 = arith.negf %102 : vector<8x128xf32>
    %104 = math.exp %103 : vector<8x128xf32>
    %cst_18 = arith.constant 1.000000e+00 : f32
    %105 = vector.broadcast %cst_18 : f32 to vector<8x128xf32>
    %106 = arith.addf %105, %104 : vector<8x128xf32>
    %107 = arith.divf %105, %106 : vector<8x128xf32>
    %108 = math.tanh %102 : vector<8x128xf32>
    %109 = vector.extract_strided_slice %107 {offsets = [0, 0], sizes = [8, 32], strides = [1, 1]} : vector<8x128xf32> to vector<8x32xf32>
    %110 = vector.extract_strided_slice %107 {offsets = [0, 32], sizes = [8, 32], strides = [1, 1]} : vector<8x128xf32> to vector<8x32xf32>
    %111 = vector.extract_strided_slice %108 {offsets = [0, 64], sizes = [8, 32], strides = [1, 1]} : vector<8x128xf32> to vector<8x32xf32>
    %112 = vector.extract_strided_slice %107 {offsets = [0, 96], sizes = [8, 32], strides = [1, 1]} : vector<8x128xf32> to vector<8x32xf32>
    %113 = arith.mulf %110, %96 : vector<8x32xf32>
    %114 = arith.mulf %109, %111 : vector<8x32xf32>
    %115 = arith.addf %113, %114 : vector<8x32xf32>
    %116 = math.tanh %115 : vector<8x32xf32>
    %117 = arith.mulf %112, %116 : vector<8x32xf32>
    %118 = vector.extract_strided_slice %8 {offsets = [6, 0, 0], sizes = [1, 8, 128], strides = [1, 1, 1]} : vector<8x8x128xf32> to vector<1x8x128xf32>
    %119 = vector.shape_cast %118 : vector<1x8x128xf32> to vector<8x128xf32>
    %cst_19 = arith.constant dense<0.000000e+00> : vector<8x128xf32>
    %120 = tpu.matmul %117, %3, %cst_19 {dimension_numbers = #tpu.dot_dimension_numbers<[1], [0], [0], [1], [0, 0, 1, 1], [], []>} : vector<8x32xf32>, vector<32x128xf32>, vector<8x128xf32> -> vector<8x128xf32>
    %121 = arith.addf %119, %120 : vector<8x128xf32>
    %122 = arith.negf %121 : vector<8x128xf32>
    %123 = math.exp %122 : vector<8x128xf32>
    %cst_20 = arith.constant 1.000000e+00 : f32
    %124 = vector.broadcast %cst_20 : f32 to vector<8x128xf32>
    %125 = arith.addf %124, %123 : vector<8x128xf32>
    %126 = arith.divf %124, %125 : vector<8x128xf32>
    %127 = math.tanh %121 : vector<8x128xf32>
    %128 = vector.extract_strided_slice %126 {offsets = [0, 0], sizes = [8, 32], strides = [1, 1]} : vector<8x128xf32> to vector<8x32xf32>
    %129 = vector.extract_strided_slice %126 {offsets = [0, 32], sizes = [8, 32], strides = [1, 1]} : vector<8x128xf32> to vector<8x32xf32>
    %130 = vector.extract_strided_slice %127 {offsets = [0, 64], sizes = [8, 32], strides = [1, 1]} : vector<8x128xf32> to vector<8x32xf32>
    %131 = vector.extract_strided_slice %126 {offsets = [0, 96], sizes = [8, 32], strides = [1, 1]} : vector<8x128xf32> to vector<8x32xf32>
    %132 = arith.mulf %129, %115 : vector<8x32xf32>
    %133 = arith.mulf %128, %130 : vector<8x32xf32>
    %134 = arith.addf %132, %133 : vector<8x32xf32>
    %135 = math.tanh %134 : vector<8x32xf32>
    %136 = arith.mulf %131, %135 : vector<8x32xf32>
    %137 = vector.extract_strided_slice %8 {offsets = [7, 0, 0], sizes = [1, 8, 128], strides = [1, 1, 1]} : vector<8x8x128xf32> to vector<1x8x128xf32>
    %138 = vector.shape_cast %137 : vector<1x8x128xf32> to vector<8x128xf32>
    %cst_21 = arith.constant dense<0.000000e+00> : vector<8x128xf32>
    %139 = tpu.matmul %136, %3, %cst_21 {dimension_numbers = #tpu.dot_dimension_numbers<[1], [0], [0], [1], [0, 0, 1, 1], [], []>} : vector<8x32xf32>, vector<32x128xf32>, vector<8x128xf32> -> vector<8x128xf32>
    %140 = arith.addf %138, %139 : vector<8x128xf32>
    %141 = arith.negf %140 : vector<8x128xf32>
    %142 = math.exp %141 : vector<8x128xf32>
    %cst_22 = arith.constant 1.000000e+00 : f32
    %143 = vector.broadcast %cst_22 : f32 to vector<8x128xf32>
    %144 = arith.addf %143, %142 : vector<8x128xf32>
    %145 = arith.divf %143, %144 : vector<8x128xf32>
    %146 = math.tanh %140 : vector<8x128xf32>
    %147 = vector.extract_strided_slice %145 {offsets = [0, 0], sizes = [8, 32], strides = [1, 1]} : vector<8x128xf32> to vector<8x32xf32>
    %148 = vector.extract_strided_slice %145 {offsets = [0, 32], sizes = [8, 32], strides = [1, 1]} : vector<8x128xf32> to vector<8x32xf32>
    %149 = vector.extract_strided_slice %146 {offsets = [0, 64], sizes = [8, 32], strides = [1, 1]} : vector<8x128xf32> to vector<8x32xf32>
    %150 = vector.extract_strided_slice %145 {offsets = [0, 96], sizes = [8, 32], strides = [1, 1]} : vector<8x128xf32> to vector<8x32xf32>
    %151 = arith.mulf %148, %134 : vector<8x32xf32>
    %152 = arith.mulf %147, %149 : vector<8x32xf32>
    %153 = arith.addf %151, %152 : vector<8x32xf32>
    %154 = math.tanh %153 : vector<8x32xf32>
    %155 = arith.mulf %150, %154 : vector<8x32xf32>
    %156 = tpu.concatenate %22, %41, %60, %79, %98, %117, %136, %155 in 0 : vector<8x32xf32>, vector<8x32xf32>, vector<8x32xf32>, vector<8x32xf32>, vector<8x32xf32>, vector<8x32xf32>, vector<8x32xf32>, vector<8x32xf32> -> vector<64x32xf32>
    %c0_23 = arith.constant 0 : index
    %c0_24 = arith.constant 0 : index
    %157 = vector.load %arg5[%c0_23, %c0_24] : memref<32x128xf32, #tpu.memory_space<vmem>>, vector<32x128xf32>
    %c0_25 = arith.constant 0 : index
    %c0_26 = arith.constant 0 : index
    %158 = vector.load %arg6[%c0_25, %c0_26] : memref<32x128xf32, #tpu.memory_space<vmem>>, vector<32x128xf32>
    %c0_27 = arith.constant 0 : index
    %c0_28 = arith.constant 0 : index
    %159 = vector.load %arg7[%c0_27, %c0_28] : memref<1x128xf32, #tpu.memory_space<vmem>>, vector<1x128xf32>
    %cst_29 = arith.constant dense<0.000000e+00> : vector<64x128xf32>
    %160 = tpu.matmul %156, %157, %cst_29 {dimension_numbers = #tpu.dot_dimension_numbers<[1], [0], [0], [1], [0, 0, 1, 1], [], []>} : vector<64x32xf32>, vector<32x128xf32>, vector<64x128xf32> -> vector<64x128xf32>
    %161 = vector.broadcast %159 : vector<1x128xf32> to vector<64x128xf32>
    %162 = arith.addf %160, %161 : vector<64x128xf32>
    %163 = vector.shape_cast %162 : vector<64x128xf32> to vector<8x8x128xf32>
    %164 = vector.extract_strided_slice %163 {offsets = [0, 0, 0], sizes = [1, 8, 128], strides = [1, 1, 1]} : vector<8x8x128xf32> to vector<1x8x128xf32>
    %165 = vector.shape_cast %164 : vector<1x8x128xf32> to vector<8x128xf32>
    %166 = arith.negf %165 : vector<8x128xf32>
    %167 = math.exp %166 : vector<8x128xf32>
    %cst_30 = arith.constant 1.000000e+00 : f32
    %168 = vector.broadcast %cst_30 : f32 to vector<8x128xf32>
    %169 = arith.addf %168, %167 : vector<8x128xf32>
    %170 = arith.divf %168, %169 : vector<8x128xf32>
    %171 = math.tanh %165 : vector<8x128xf32>
    %172 = vector.extract_strided_slice %170 {offsets = [0, 0], sizes = [8, 32], strides = [1, 1]} : vector<8x128xf32> to vector<8x32xf32>
    %173 = vector.extract_strided_slice %171 {offsets = [0, 64], sizes = [8, 32], strides = [1, 1]} : vector<8x128xf32> to vector<8x32xf32>
    %174 = vector.extract_strided_slice %170 {offsets = [0, 96], sizes = [8, 32], strides = [1, 1]} : vector<8x128xf32> to vector<8x32xf32>
    %175 = arith.mulf %172, %173 : vector<8x32xf32>
    %176 = math.tanh %175 : vector<8x32xf32>
    %177 = arith.mulf %174, %176 : vector<8x32xf32>
    %178 = vector.extract_strided_slice %163 {offsets = [1, 0, 0], sizes = [1, 8, 128], strides = [1, 1, 1]} : vector<8x8x128xf32> to vector<1x8x128xf32>
    %179 = vector.shape_cast %178 : vector<1x8x128xf32> to vector<8x128xf32>
    %cst_31 = arith.constant dense<0.000000e+00> : vector<8x128xf32>
    %180 = tpu.matmul %177, %158, %cst_31 {dimension_numbers = #tpu.dot_dimension_numbers<[1], [0], [0], [1], [0, 0, 1, 1], [], []>} : vector<8x32xf32>, vector<32x128xf32>, vector<8x128xf32> -> vector<8x128xf32>
    %181 = arith.addf %179, %180 : vector<8x128xf32>
    %182 = arith.negf %181 : vector<8x128xf32>
    %183 = math.exp %182 : vector<8x128xf32>
    %cst_32 = arith.constant 1.000000e+00 : f32
    %184 = vector.broadcast %cst_32 : f32 to vector<8x128xf32>
    %185 = arith.addf %184, %183 : vector<8x128xf32>
    %186 = arith.divf %184, %185 : vector<8x128xf32>
    %187 = math.tanh %181 : vector<8x128xf32>
    %188 = vector.extract_strided_slice %186 {offsets = [0, 0], sizes = [8, 32], strides = [1, 1]} : vector<8x128xf32> to vector<8x32xf32>
    %189 = vector.extract_strided_slice %186 {offsets = [0, 32], sizes = [8, 32], strides = [1, 1]} : vector<8x128xf32> to vector<8x32xf32>
    %190 = vector.extract_strided_slice %187 {offsets = [0, 64], sizes = [8, 32], strides = [1, 1]} : vector<8x128xf32> to vector<8x32xf32>
    %191 = vector.extract_strided_slice %186 {offsets = [0, 96], sizes = [8, 32], strides = [1, 1]} : vector<8x128xf32> to vector<8x32xf32>
    %192 = arith.mulf %189, %175 : vector<8x32xf32>
    %193 = arith.mulf %188, %190 : vector<8x32xf32>
    %194 = arith.addf %192, %193 : vector<8x32xf32>
    %195 = math.tanh %194 : vector<8x32xf32>
    %196 = arith.mulf %191, %195 : vector<8x32xf32>
    %197 = vector.extract_strided_slice %163 {offsets = [2, 0, 0], sizes = [1, 8, 128], strides = [1, 1, 1]} : vector<8x8x128xf32> to vector<1x8x128xf32>
    %198 = vector.shape_cast %197 : vector<1x8x128xf32> to vector<8x128xf32>
    %cst_33 = arith.constant dense<0.000000e+00> : vector<8x128xf32>
    %199 = tpu.matmul %196, %158, %cst_33 {dimension_numbers = #tpu.dot_dimension_numbers<[1], [0], [0], [1], [0, 0, 1, 1], [], []>} : vector<8x32xf32>, vector<32x128xf32>, vector<8x128xf32> -> vector<8x128xf32>
    %200 = arith.addf %198, %199 : vector<8x128xf32>
    %201 = arith.negf %200 : vector<8x128xf32>
    %202 = math.exp %201 : vector<8x128xf32>
    %cst_34 = arith.constant 1.000000e+00 : f32
    %203 = vector.broadcast %cst_34 : f32 to vector<8x128xf32>
    %204 = arith.addf %203, %202 : vector<8x128xf32>
    %205 = arith.divf %203, %204 : vector<8x128xf32>
    %206 = math.tanh %200 : vector<8x128xf32>
    %207 = vector.extract_strided_slice %205 {offsets = [0, 0], sizes = [8, 32], strides = [1, 1]} : vector<8x128xf32> to vector<8x32xf32>
    %208 = vector.extract_strided_slice %205 {offsets = [0, 32], sizes = [8, 32], strides = [1, 1]} : vector<8x128xf32> to vector<8x32xf32>
    %209 = vector.extract_strided_slice %206 {offsets = [0, 64], sizes = [8, 32], strides = [1, 1]} : vector<8x128xf32> to vector<8x32xf32>
    %210 = vector.extract_strided_slice %205 {offsets = [0, 96], sizes = [8, 32], strides = [1, 1]} : vector<8x128xf32> to vector<8x32xf32>
    %211 = arith.mulf %208, %194 : vector<8x32xf32>
    %212 = arith.mulf %207, %209 : vector<8x32xf32>
    %213 = arith.addf %211, %212 : vector<8x32xf32>
    %214 = math.tanh %213 : vector<8x32xf32>
    %215 = arith.mulf %210, %214 : vector<8x32xf32>
    %216 = vector.extract_strided_slice %163 {offsets = [3, 0, 0], sizes = [1, 8, 128], strides = [1, 1, 1]} : vector<8x8x128xf32> to vector<1x8x128xf32>
    %217 = vector.shape_cast %216 : vector<1x8x128xf32> to vector<8x128xf32>
    %cst_35 = arith.constant dense<0.000000e+00> : vector<8x128xf32>
    %218 = tpu.matmul %215, %158, %cst_35 {dimension_numbers = #tpu.dot_dimension_numbers<[1], [0], [0], [1], [0, 0, 1, 1], [], []>} : vector<8x32xf32>, vector<32x128xf32>, vector<8x128xf32> -> vector<8x128xf32>
    %219 = arith.addf %217, %218 : vector<8x128xf32>
    %220 = arith.negf %219 : vector<8x128xf32>
    %221 = math.exp %220 : vector<8x128xf32>
    %cst_36 = arith.constant 1.000000e+00 : f32
    %222 = vector.broadcast %cst_36 : f32 to vector<8x128xf32>
    %223 = arith.addf %222, %221 : vector<8x128xf32>
    %224 = arith.divf %222, %223 : vector<8x128xf32>
    %225 = math.tanh %219 : vector<8x128xf32>
    %226 = vector.extract_strided_slice %224 {offsets = [0, 0], sizes = [8, 32], strides = [1, 1]} : vector<8x128xf32> to vector<8x32xf32>
    %227 = vector.extract_strided_slice %224 {offsets = [0, 32], sizes = [8, 32], strides = [1, 1]} : vector<8x128xf32> to vector<8x32xf32>
    %228 = vector.extract_strided_slice %225 {offsets = [0, 64], sizes = [8, 32], strides = [1, 1]} : vector<8x128xf32> to vector<8x32xf32>
    %229 = vector.extract_strided_slice %224 {offsets = [0, 96], sizes = [8, 32], strides = [1, 1]} : vector<8x128xf32> to vector<8x32xf32>
    %230 = arith.mulf %227, %213 : vector<8x32xf32>
    %231 = arith.mulf %226, %228 : vector<8x32xf32>
    %232 = arith.addf %230, %231 : vector<8x32xf32>
    %233 = math.tanh %232 : vector<8x32xf32>
    %234 = arith.mulf %229, %233 : vector<8x32xf32>
    %235 = vector.extract_strided_slice %163 {offsets = [4, 0, 0], sizes = [1, 8, 128], strides = [1, 1, 1]} : vector<8x8x128xf32> to vector<1x8x128xf32>
    %236 = vector.shape_cast %235 : vector<1x8x128xf32> to vector<8x128xf32>
    %cst_37 = arith.constant dense<0.000000e+00> : vector<8x128xf32>
    %237 = tpu.matmul %234, %158, %cst_37 {dimension_numbers = #tpu.dot_dimension_numbers<[1], [0], [0], [1], [0, 0, 1, 1], [], []>} : vector<8x32xf32>, vector<32x128xf32>, vector<8x128xf32> -> vector<8x128xf32>
    %238 = arith.addf %236, %237 : vector<8x128xf32>
    %239 = arith.negf %238 : vector<8x128xf32>
    %240 = math.exp %239 : vector<8x128xf32>
    %cst_38 = arith.constant 1.000000e+00 : f32
    %241 = vector.broadcast %cst_38 : f32 to vector<8x128xf32>
    %242 = arith.addf %241, %240 : vector<8x128xf32>
    %243 = arith.divf %241, %242 : vector<8x128xf32>
    %244 = math.tanh %238 : vector<8x128xf32>
    %245 = vector.extract_strided_slice %243 {offsets = [0, 0], sizes = [8, 32], strides = [1, 1]} : vector<8x128xf32> to vector<8x32xf32>
    %246 = vector.extract_strided_slice %243 {offsets = [0, 32], sizes = [8, 32], strides = [1, 1]} : vector<8x128xf32> to vector<8x32xf32>
    %247 = vector.extract_strided_slice %244 {offsets = [0, 64], sizes = [8, 32], strides = [1, 1]} : vector<8x128xf32> to vector<8x32xf32>
    %248 = vector.extract_strided_slice %243 {offsets = [0, 96], sizes = [8, 32], strides = [1, 1]} : vector<8x128xf32> to vector<8x32xf32>
    %249 = arith.mulf %246, %232 : vector<8x32xf32>
    %250 = arith.mulf %245, %247 : vector<8x32xf32>
    %251 = arith.addf %249, %250 : vector<8x32xf32>
    %252 = math.tanh %251 : vector<8x32xf32>
    %253 = arith.mulf %248, %252 : vector<8x32xf32>
    %254 = vector.extract_strided_slice %163 {offsets = [5, 0, 0], sizes = [1, 8, 128], strides = [1, 1, 1]} : vector<8x8x128xf32> to vector<1x8x128xf32>
    %255 = vector.shape_cast %254 : vector<1x8x128xf32> to vector<8x128xf32>
    %cst_39 = arith.constant dense<0.000000e+00> : vector<8x128xf32>
    %256 = tpu.matmul %253, %158, %cst_39 {dimension_numbers = #tpu.dot_dimension_numbers<[1], [0], [0], [1], [0, 0, 1, 1], [], []>} : vector<8x32xf32>, vector<32x128xf32>, vector<8x128xf32> -> vector<8x128xf32>
    %257 = arith.addf %255, %256 : vector<8x128xf32>
    %258 = arith.negf %257 : vector<8x128xf32>
    %259 = math.exp %258 : vector<8x128xf32>
    %cst_40 = arith.constant 1.000000e+00 : f32
    %260 = vector.broadcast %cst_40 : f32 to vector<8x128xf32>
    %261 = arith.addf %260, %259 : vector<8x128xf32>
    %262 = arith.divf %260, %261 : vector<8x128xf32>
    %263 = math.tanh %257 : vector<8x128xf32>
    %264 = vector.extract_strided_slice %262 {offsets = [0, 0], sizes = [8, 32], strides = [1, 1]} : vector<8x128xf32> to vector<8x32xf32>
    %265 = vector.extract_strided_slice %262 {offsets = [0, 32], sizes = [8, 32], strides = [1, 1]} : vector<8x128xf32> to vector<8x32xf32>
    %266 = vector.extract_strided_slice %263 {offsets = [0, 64], sizes = [8, 32], strides = [1, 1]} : vector<8x128xf32> to vector<8x32xf32>
    %267 = vector.extract_strided_slice %262 {offsets = [0, 96], sizes = [8, 32], strides = [1, 1]} : vector<8x128xf32> to vector<8x32xf32>
    %268 = arith.mulf %265, %251 : vector<8x32xf32>
    %269 = arith.mulf %264, %266 : vector<8x32xf32>
    %270 = arith.addf %268, %269 : vector<8x32xf32>
    %271 = math.tanh %270 : vector<8x32xf32>
    %272 = arith.mulf %267, %271 : vector<8x32xf32>
    %273 = vector.extract_strided_slice %163 {offsets = [6, 0, 0], sizes = [1, 8, 128], strides = [1, 1, 1]} : vector<8x8x128xf32> to vector<1x8x128xf32>
    %274 = vector.shape_cast %273 : vector<1x8x128xf32> to vector<8x128xf32>
    %cst_41 = arith.constant dense<0.000000e+00> : vector<8x128xf32>
    %275 = tpu.matmul %272, %158, %cst_41 {dimension_numbers = #tpu.dot_dimension_numbers<[1], [0], [0], [1], [0, 0, 1, 1], [], []>} : vector<8x32xf32>, vector<32x128xf32>, vector<8x128xf32> -> vector<8x128xf32>
    %276 = arith.addf %274, %275 : vector<8x128xf32>
    %277 = arith.negf %276 : vector<8x128xf32>
    %278 = math.exp %277 : vector<8x128xf32>
    %cst_42 = arith.constant 1.000000e+00 : f32
    %279 = vector.broadcast %cst_42 : f32 to vector<8x128xf32>
    %280 = arith.addf %279, %278 : vector<8x128xf32>
    %281 = arith.divf %279, %280 : vector<8x128xf32>
    %282 = math.tanh %276 : vector<8x128xf32>
    %283 = vector.extract_strided_slice %281 {offsets = [0, 0], sizes = [8, 32], strides = [1, 1]} : vector<8x128xf32> to vector<8x32xf32>
    %284 = vector.extract_strided_slice %281 {offsets = [0, 32], sizes = [8, 32], strides = [1, 1]} : vector<8x128xf32> to vector<8x32xf32>
    %285 = vector.extract_strided_slice %282 {offsets = [0, 64], sizes = [8, 32], strides = [1, 1]} : vector<8x128xf32> to vector<8x32xf32>
    %286 = vector.extract_strided_slice %281 {offsets = [0, 96], sizes = [8, 32], strides = [1, 1]} : vector<8x128xf32> to vector<8x32xf32>
    %287 = arith.mulf %284, %270 : vector<8x32xf32>
    %288 = arith.mulf %283, %285 : vector<8x32xf32>
    %289 = arith.addf %287, %288 : vector<8x32xf32>
    %290 = math.tanh %289 : vector<8x32xf32>
    %291 = arith.mulf %286, %290 : vector<8x32xf32>
    %292 = vector.extract_strided_slice %163 {offsets = [7, 0, 0], sizes = [1, 8, 128], strides = [1, 1, 1]} : vector<8x8x128xf32> to vector<1x8x128xf32>
    %293 = vector.shape_cast %292 : vector<1x8x128xf32> to vector<8x128xf32>
    %cst_43 = arith.constant dense<0.000000e+00> : vector<8x128xf32>
    %294 = tpu.matmul %291, %158, %cst_43 {dimension_numbers = #tpu.dot_dimension_numbers<[1], [0], [0], [1], [0, 0, 1, 1], [], []>} : vector<8x32xf32>, vector<32x128xf32>, vector<8x128xf32> -> vector<8x128xf32>
    %295 = arith.addf %293, %294 : vector<8x128xf32>
    %296 = arith.negf %295 : vector<8x128xf32>
    %297 = math.exp %296 : vector<8x128xf32>
    %cst_44 = arith.constant 1.000000e+00 : f32
    %298 = vector.broadcast %cst_44 : f32 to vector<8x128xf32>
    %299 = arith.addf %298, %297 : vector<8x128xf32>
    %300 = arith.divf %298, %299 : vector<8x128xf32>
    %301 = math.tanh %295 : vector<8x128xf32>
    %302 = vector.extract_strided_slice %300 {offsets = [0, 0], sizes = [8, 32], strides = [1, 1]} : vector<8x128xf32> to vector<8x32xf32>
    %303 = vector.extract_strided_slice %300 {offsets = [0, 32], sizes = [8, 32], strides = [1, 1]} : vector<8x128xf32> to vector<8x32xf32>
    %304 = vector.extract_strided_slice %301 {offsets = [0, 64], sizes = [8, 32], strides = [1, 1]} : vector<8x128xf32> to vector<8x32xf32>
    %305 = vector.extract_strided_slice %300 {offsets = [0, 96], sizes = [8, 32], strides = [1, 1]} : vector<8x128xf32> to vector<8x32xf32>
    %306 = arith.mulf %303, %289 : vector<8x32xf32>
    %307 = arith.mulf %302, %304 : vector<8x32xf32>
    %308 = arith.addf %306, %307 : vector<8x32xf32>
    %309 = math.tanh %308 : vector<8x32xf32>
    %310 = arith.mulf %305, %309 : vector<8x32xf32>
    %c0_45 = arith.constant 0 : index
    %c0_46 = arith.constant 0 : index
    %311 = vector.load %arg8[%c0_45, %c0_46] : memref<32x128xf32, #tpu.memory_space<vmem>>, vector<32x128xf32>
    %cst_47 = arith.constant dense<0.000000e+00> : vector<8x128xf32>
    %312 = tpu.matmul %310, %311, %cst_47 {dimension_numbers = #tpu.dot_dimension_numbers<[1], [0], [0], [1], [0, 0, 1, 1], [], []>} : vector<8x32xf32>, vector<32x128xf32>, vector<8x128xf32> -> vector<8x128xf32>
    %c0_48 = arith.constant 0 : index
    %c0_49 = arith.constant 0 : index
    %313 = vector.load %arg9[%c0_48, %c0_49] : memref<1x128xf32, #tpu.memory_space<vmem>>, vector<1x128xf32>
    %314 = vector.broadcast %313 : vector<1x128xf32> to vector<8x128xf32>
    %315 = arith.addf %312, %314 : vector<8x128xf32>
    %316 = vector.shape_cast %315 : vector<8x128xf32> to vector<1x8x128xf32>
    %c0_50 = arith.constant 0 : index
    %c0_51 = arith.constant 0 : index
    %c0_52 = arith.constant 0 : index
    %317 = vector.load %arg10[%c0_50, %c0_51, %c0_52] : memref<1x8x128xf32, #tpu.memory_space<vmem>>, vector<1x8x128xf32>
    tpu.vector_store %arg10[%c0_50, %c0_51, %c0_52], %316 {strides = array<i32>} : memref<1x8x128xf32, #tpu.memory_space<vmem>>, vector<1x8x128xf32>,
    return
  }
  func.func @transform_0(%arg0: i32) -> (i32, i32, i32) {
    %c0_i32 = arith.constant 0 : i32
    %c0_i32_0 = arith.constant 0 : i32
    %c0_i32_1 = arith.constant 0 : i32
    return %c0_i32, %arg0, %c0_i32_0 : i32, i32, i32
  }
  func.func @transform_1(%arg0: i32) -> (i32, i32) {
    %c0_i32 = arith.constant 0 : i32
    %c0_i32_0 = arith.constant 0 : i32
    %c0_i32_1 = arith.constant 0 : i32
    return %c0_i32, %c0_i32_0 : i32, i32
  }
  func.func @transform_2(%arg0: i32) -> (i32, i32) {
    %c0_i32 = arith.constant 0 : i32
    %c0_i32_0 = arith.constant 0 : i32
    %c0_i32_1 = arith.constant 0 : i32
    return %c0_i32, %c0_i32_0 : i32, i32
  }
  func.func @transform_3(%arg0: i32) -> (i32, i32) {
    %c0_i32 = arith.constant 0 : i32
    %c0_i32_0 = arith.constant 0 : i32
    %c0_i32_1 = arith.constant 0 : i32
    return %c0_i32, %c0_i32_0 : i32, i32
  }
  func.func @transform_4(%arg0: i32) -> (i32, i32) {
    %c0_i32 = arith.constant 0 : i32
    %c0_i32_0 = arith.constant 0 : i32
    %c0_i32_1 = arith.constant 0 : i32
    return %c0_i32, %c0_i32_0 : i32, i32
  }
  func.func @transform_5(%arg0: i32) -> (i32, i32) {
    %c0_i32 = arith.constant 0 : i32
    %c0_i32_0 = arith.constant 0 : i32
    %c0_i32_1 = arith.constant 0 : i32
    return %c0_i32, %c0_i32_0 : i32, i32
  }
  func.func @transform_6(%arg0: i32) -> (i32, i32) {
    %c0_i32 = arith.constant 0 : i32
    %c0_i32_0 = arith.constant 0 : i32
    %c0_i32_1 = arith.constant 0 : i32
    return %c0_i32, %c0_i32_0 : i32, i32
  }
  func.func @transform_7(%arg0: i32) -> (i32, i32) {
    %c0_i32 = arith.constant 0 : i32
    %c0_i32_0 = arith.constant 0 : i32
    %c0_i32_1 = arith.constant 0 : i32
    return %c0_i32, %c0_i32_0 : i32, i32
  }
  func.func @transform_8(%arg0: i32) -> (i32, i32) {
    %c0_i32 = arith.constant 0 : i32
    %c0_i32_0 = arith.constant 0 : i32
    %c0_i32_1 = arith.constant 0 : i32
    return %c0_i32, %c0_i32_0 : i32, i32
  }
  func.func @transform_9(%arg0: i32) -> (i32, i32, i32) {
    %c0_i32 = arith.constant 0 : i32
    %c0_i32_0 = arith.constant 0 : i32
    %c0_i32_1 = arith.constant 0 : i32
    return %c0_i32, %arg0, %c0_i32_0 : i32, i32, i32
  }
}

</mosaic_0001>

<bundles_post_ra>
// kernel: lstm_linear_forward.1
= control target key start
LH: loop header
LB: loop body
LE: loop exit
PB: predicated region body
PF: predicated region fallthrough
CT: control target
= control target key end

     0   :  { %vm74_vm0 = vcmask 1043456   ;;  %vm49_vm1 = vcmask 31744   ;;  %s1354_s15 = smov 64   ;;  %vm153_vm6 = vcmask 261120   ;;  %s1667_s1 = inlined_call_operand.vmem [shape: f32[4,128], index: 1, kind: input, shape index: {}]   ;;  %s1668_s0 = inlined_call_operand.vmem [shape: f32[8,8,4], index: 0, kind: input, shape index: {}]   ;;  %s1669_s3 = inlined_call_operand.vmem [shape: f32[1,128], index: 3, kind: input, shape index: {}]   ;;  %s1670_s2 = inlined_call_operand.vmem [shape: f32[32,128], index: 2, kind: input, shape index: {}]   ;;  %s1671_s4 = inlined_call_operand.vmem [shape: f32[32,128], index: 4, kind: input, shape index: {}]   ;;  %s1672_s6 = inlined_call_operand.vmem [shape: f32[1,128], index: 6, kind: input, shape index: {}]   ;;  %s1673_s5 = inlined_call_operand.vmem [shape: f32[32,128], index: 5, kind: input, shape index: {}]   ;;  %s1674_s7 = inlined_call_operand.vmem [shape: f32[32,128], index: 7, kind: input, shape index: {}]   ;;  %s1675_s8 = inlined_call_operand.vmem [shape: f32[1,128], index: 8, kind: input, shape index: {}]   ;;  %s1676_s9 = inlined_call_operand.vmem [shape: f32[1,8,128], index: 9, kind: output, shape index: {}]  }
   0x1   :  { %v40_v0 = vld [vmem:[%s1667_s1] sm:$0xf]  ;;  %s1355_s1 = smov 32   ;;  %v44_v22 = vld [vmem:[%s1670_s2 + $0x18] sm:$0xff]  ;;  %v43_v23 = vld [vmem:[%s1670_s2 + $0x10] sm:$0xff] }
   0x2   :  { %v32_v1 = vld [vmem:[%s1668_s0] sm:$0xff]  ;;  %1168 = vmatpush.msk.msra.mxu0 %vm74_vm0, %v40_v0  ;;  %168 = vmatpush.msra.mxu1 %v44_v22  ;;  %v33_v24 = vld [vmem:[%s1668_s0 + $0x8] sm:$0xff]  ;;  %v34_v57 = vld [vmem:[%s1668_s0 + $0x10] sm:$0xff] }
   0x3   :  { %1169 = vmatmul.msk.f32.vlgmr.msra.gmra.mxu0 %vm49_vm1, %v32_v1  ;;  %v1417_v2 = vld [vmem:[%s1669_s3] ss:$0 sm:$0xff]  ;;  %s1356_s3 = smov 96   ;;  %235 = vmatpush.msra.mxu2 %v44_v22  ;;  %v42_v25 = vld [vmem:[%s1670_s2 + $0x8] sm:$0xff] }
   0x4   :  { %298 = vmatpush.msra.mxu3 %v44_v22  ;;  %169 = vmatpush.msra.mxu1 %v43_v23  ;;  %v41_v26 = vld [vmem:[%s1670_s2] sm:$0xff] }
   0x5   :  { %236 = vmatpush.msra.mxu2 %v43_v23 }
   0x6   :  { %299 = vmatpush.msra.mxu3 %v43_v23  ;;  %170 = vmatpush.msra.mxu1 %v42_v25 }
   0x7   :  { %237 = vmatpush.msra.mxu2 %v42_v25 }
   0x8   :  { %300 = vmatpush.msra.mxu3 %v42_v25  ;;  %171 = vmatpush.msra.mxu1 %v41_v26 }
   0x9   :  { %238 = vmatpush.msra.mxu2 %v41_v26 }
   0xa   :  { %301 = vmatpush.msra.mxu3 %v41_v26  ;;  %361 = vmatpush.msrb.mxu1 %v44_v22 }
   0xb   :  { %1170 = vmatmul.msk.f32.gmra.mxu0 %vm49_vm1, %v33_v24  ;;  %424 = vmatpush.msrb.mxu2 %v44_v22 }
   0xc   :  { %487 = vmatpush.msrb.mxu3 %v44_v22  ;;  %362 = vmatpush.msrb.mxu1 %v43_v23 }
   0xd   :  { %425 = vmatpush.msrb.mxu2 %v43_v23 }
   0xe   :  { %488 = vmatpush.msrb.mxu3 %v43_v23  ;;  %363 = vmatpush.msrb.mxu1 %v42_v25 }
   0xf   :  { %426 = vmatpush.msrb.mxu2 %v42_v25 }
  0x10   :  { %489 = vmatpush.msrb.mxu3 %v42_v25  ;;  %364 = vmatpush.msrb.mxu1 %v41_v26 }
  0x11   :  { %427 = vmatpush.msrb.mxu2 %v41_v26 }
  0x12   :  { %490 = vmatpush.msrb.mxu3 %v41_v26 }
  0x13   :  { %1171 = vmatmul.msk.f32.gmra.mxu0 %vm49_vm1, %v34_v57 }
  0x80   :  { %v95_v3 = vpop.f32.mrf.mxu0 }
  0x81   :  { %v96_v4 = vadd.f32 %v1417_v2, %v95_v3 }
  0x83   :  { %1226 = vtanh.f32 %v96_v4  ;;  %v1177_v6 = vmul.f32 -1.442695, %v96_v4 }
  0x85   :  { %1228 = vpow2.f32 %v1177_v6 }
  0x88   :  { %v98_v30 = vpop.f32.mrf.mxu0 }
  0x89   :  { %v1227_v5 = vpop.eup %1226  ;;  %v99_v31 = vadd.f32 %v1417_v2, %v98_v30 }
  0x8a   :  { %140 = vrot.lane.b32.xlu0 %v1227_v5, %s1354_s15 }
  0x8b   :  { %v1229_v7 = vpop.eup %1228 }
  0x8c   :  { %v122_v8 = vadd.f32 1.0, %v1229_v7 }
  0x8e   :  { %1230 = vrcp.f32 %v122_v8  ;;  %v134_v14 = vand.u32 2147483648, %v122_v8  ;;  %vm128_vm3 = vweird.f32 %v122_v8  ;;  %v132_v15 = vand.u32 2147483647, %v122_v8 }
  0x90   :  { %v135_v17 = vor.u32 1.1754944e-38, %v134_v14  ;;  %vm133_vm5 = vcmp.eq.f32.partialorder %v132_v15, 8.507059e+37  ;;  %v101_v59 = vpop.f32.mrf.mxu0 }
  0x91   :  { %v102_v60 = vadd.f32 %v1417_v2, %v101_v59 }
  0x94   :  { %v1231_v9 = vpop.eup %1230 }
  0x95   :  { %v124_v10 = vmul.f32 %v1231_v9, %v122_v8  ;;  %vm129_vm2 = vweird.f32 %v1231_v9 }
  0x96   :  { %vm130_vm4 = vmor %vm128_vm3, %vm129_vm2 }
  0x97   :  { %v125_v11 = vsub.f32 1.0, %v124_v10 }
  0x99   :  { %v126_v12 = vmul.f32 %v1231_v9, %v125_v11 }
  0x9b   :  { %v127_v13 = vadd.f32 %v1231_v9, %v126_v12 }
  0x9d   :  { %v131_v16 = vsel %vm130_vm4, %v1231_v9, %v127_v13 }
  0x9e   :  { %v136_v19 = vsel %vm133_vm5, %v135_v17, %v131_v16 }
  0xfc   :  { %v141_v18 = vpop.permute.xlu0 %140 }
  0xfd   :  { %v143_v20 = vmul.f32 %v141_v18, %v136_v19 }
  0xff   :  { %1232 = vtanh.f32 %v143_v20  ;;  %198 = vrot.lane.b32.xlu2 %v143_v20, %s1355_s1 }
 0x105   :  { %v1233_v21 = vpop.eup %1232 }
 0x106   :  { %146 = vrot.lane.b32.xlu0 %v1233_v21, %s1356_s3 }
 0x159   :  { %v199_v50 = vpop.permute.xlu2 %198 }
 0x178   :  { %v147_v27 = vpop.permute.xlu0 %146 }
 0x179   :  { %v149_v28 = vmul.f32 %v147_v27, %v136_v19 }
 0x17b   :  { %151 = vrot.lane.b32.xlu1 %v149_v28, %s1355_s1 }
 0x1ed   :  { %v1440_v29 = vpop.permute.xlu1 %151 }
 0x1ee   :  { %1178 = vmatmul.msk.f32.vlgmr.msra.gmra.mxu1 %vm153_vm6, %v1440_v29 }
 0x1ef   :  { %550 = vmatpush.msra.mxu1 %v44_v22  ;;  %v35_v22 = vld [vmem:[%s1668_s0 + $0x18] sm:$0xff] }
 0x1f0   :  { %1172 = vmatmul.msk.f32.gmra.mxu0 %vm49_vm1, %v35_v22 }
 0x1f1   :  { %551 = vmatpush.msra.mxu1 %v43_v23 }
 0x1f3   :  { %552 = vmatpush.msra.mxu1 %v42_v25 }
 0x1f5   :  { %553 = vmatpush.msra.mxu1 %v41_v26 }
 0x26b   :  { %v173_v32 = vpop.f32.mrf.mxu1 }
 0x26c   :  { %v176_v33 = vadd.f32 %v173_v32, %v99_v31 }
 0x26d   :  { %v104_v24 = vpop.f32.mrf.mxu0 }
 0x26e   :  { %1234 = vtanh.f32 %v176_v33  ;;  %v1179_v35 = vmul.f32 -1.442695, %v176_v33  ;;  %v105_v25 = vadd.f32 %v1417_v2, %v104_v24 }
 0x270   :  { %1236 = vpow2.f32 %v1179_v35 }
 0x274   :  { %v1235_v34 = vpop.eup %1234 }
 0x275   :  { %203 = vrot.lane.b32.xlu1 %v1235_v34, %s1354_s15 }
 0x276   :  { %v1237_v36 = vpop.eup %1236 }
 0x277   :  { %v180_v37 = vadd.f32 1.0, %v1237_v36 }
 0x279   :  { %1238 = vrcp.f32 %v180_v37  ;;  %v192_v43 = vand.u32 2147483648, %v180_v37  ;;  %vm186_vm8 = vweird.f32 %v180_v37  ;;  %v190_v44 = vand.u32 2147483647, %v180_v37 }
 0x27b   :  { %v193_v46 = vor.u32 1.1754944e-38, %v192_v43  ;;  %vm191_vm10 = vcmp.eq.f32.partialorder %v190_v44, 8.507059e+37 }
 0x27f   :  { %v1239_v38 = vpop.eup %1238 }
 0x280   :  { %v182_v39 = vmul.f32 %v1239_v38, %v180_v37  ;;  %vm187_vm7 = vweird.f32 %v1239_v38 }
 0x281   :  { %vm188_vm9 = vmor %vm186_vm8, %vm187_vm7 }
 0x282   :  { %v183_v40 = vsub.f32 1.0, %v182_v39 }
 0x284   :  { %v184_v41 = vmul.f32 %v1239_v38, %v183_v40 }
 0x286   :  { %v185_v42 = vadd.f32 %v1239_v38, %v184_v41 }
 0x288   :  { %v189_v45 = vsel %vm188_vm9, %v1239_v38, %v185_v42 }
 0x289   :  { %v194_v48 = vsel %vm191_vm10, %v193_v46, %v189_v45 }
 0x28a   :  { %v201_v51 = vmul.f32 %v199_v50, %v194_v48 }
 0x2e7   :  { %v204_v47 = vpop.permute.xlu1 %203 }
 0x2e8   :  { %v206_v49 = vmul.f32 %v204_v47, %v194_v48 }
 0x2ea   :  { %208 = vrot.lane.b32.xlu2 %v206_v49, %s1355_s1  ;;  %v36_v49 = vld [vmem:[%s1668_s0 + $0x20] sm:$0xff] }
 0x2eb   :  { %1173 = vmatmul.msk.f32.gmra.mxu0 %vm49_vm1, %v36_v49 }
 0x344   :  { %v209_v52 = vpop.permute.xlu2 %208 }
 0x345   :  { %v211_v53 = vadd.f32 %v209_v52, %v201_v51 }
 0x347   :  { %1240 = vtanh.f32 %v211_v53 }
 0x34d   :  { %v1241_v54 = vpop.eup %1240 }
 0x34e   :  { %214 = vrot.lane.b32.xlu0 %v1241_v54, %s1354_s15 }
 0x3c0   :  { %v215_v55 = vpop.permute.xlu0 %214 }
 0x3c1   :  { %v217_v56 = vmul.f32 %v215_v55, %v194_v48 }
 0x3c3   :  { %219 = vrot.lane.b32.xlu1 %v217_v56, %s1355_s1 }
 0x435   :  { %v1453_v58 = vpop.permute.xlu1 %219 }
 0x436   :  { %1180 = vmatmul.msk.f32.vlgmr.msra.gmra.mxu2 %vm153_vm6, %v1453_v58 }
 0x4b9   :  { %v240_v61 = vpop.f32.mrf.mxu2 }
 0x4ba   :  { %v243_v62 = vadd.f32 %v240_v61, %v102_v60 }
 0x4bc   :  { %1242 = vtanh.f32 %v243_v62  ;;  %v1181_v0 = vmul.f32 -1.442695, %v243_v62 }
 0x4be   :  { %1244 = vpow2.f32 %v1181_v0 }
 0x4c2   :  { %v1243_v63 = vpop.eup %1242 }
 0x4c3   :  { %266 = vrot.lane.b32.xlu2 %v1243_v63, %s1354_s15 }
 0x4c4   :  { %v1245_v1 = vpop.eup %1244 }
 0x4c5   :  { %v247_v3 = vadd.f32 1.0, %v1245_v1 }
 0x4c7   :  { %1246 = vrcp.f32 %v247_v3  ;;  %v259_v9 = vand.u32 2147483648, %v247_v3  ;;  %vm253_vm12 = vweird.f32 %v247_v3  ;;  %v257_v10 = vand.u32 2147483647, %v247_v3 }
 0x4c9   :  { %v260_v12 = vor.u32 1.1754944e-38, %v259_v9  ;;  %vm258_vm14 = vcmp.eq.f32.partialorder %v257_v10, 8.507059e+37 }
 0x4cd   :  { %v1247_v4 = vpop.eup %1246 }
 0x4ce   :  { %v249_v5 = vmul.f32 %v1247_v4, %v247_v3  ;;  %vm254_vm11 = vweird.f32 %v1247_v4 }
 0x4cf   :  { %vm255_vm13 = vmor %vm253_vm12, %vm254_vm11 }
 0x4d0   :  { %v250_v6 = vsub.f32 1.0, %v249_v5 }
 0x4d2   :  { %v251_v7 = vmul.f32 %v1247_v4, %v250_v6 }
 0x4d4   :  { %v252_v8 = vadd.f32 %v1247_v4, %v251_v7 }
 0x4d6   :  { %v256_v11 = vsel %vm255_vm13, %v1247_v4, %v252_v8 }
 0x4d7   :  { %v261_v14 = vsel %vm258_vm14, %v260_v12, %v256_v11 }
 0x4d8   :  { %v264_v16 = vmul.f32 %v261_v14, %v211_v53  ;;  %v107_v53 = vpop.f32.mrf.mxu0 }
 0x4d9   :  { %v108_v54 = vadd.f32 %v1417_v2, %v107_v53 }
 0x51d   :  { %v267_v13 = vpop.permute.xlu2 %266 }
 0x51e   :  { %v269_v15 = vmul.f32 %v267_v13, %v261_v14 }
 0x520   :  { %271 = vrot.lane.b32.xlu0 %v269_v15, %s1355_s1 }
 0x592   :  { %v272_v17 = vpop.permute.xlu0 %271 }
 0x593   :  { %v274_v18 = vadd.f32 %v272_v17, %v264_v16  ;;  %v599_v17 = vld [vmem:[%s1671_s4 + $0x18] sm:$0xff] }
 0x594   :  { %625 = vmatpush.msra.mxu2 %v599_v17 }
 0x595   :  { %1248 = vtanh.f32 %v274_v18 }
 0x59b   :  { %v1249_v19 = vpop.eup %1248 }
 0x59c   :  { %277 = vrot.lane.b32.xlu1 %v1249_v19, %s1354_s15  ;;  %v37_v19 = vld [vmem:[%s1668_s0 + $0x28] sm:$0xff] }
 0x59d   :  { %1174 = vmatmul.msk.f32.gmra.mxu0 %vm49_vm1, %v37_v19 }
 0x60e   :  { %v278_v20 = vpop.permute.xlu1 %277 }
 0x60f   :  { %v280_v21 = vmul.f32 %v278_v20, %v261_v14  ;;  %v597_v20 = vld [vmem:[%s1671_s4 + $0x8] sm:$0xff] }
 0x611   :  { %282 = vrot.lane.b32.xlu2 %v280_v21, %s1355_s1  ;;  %v596_v21 = vld [vmem:[%s1671_s4] sm:$0xff] }
 0x61a   :  { %v110_v24 = vpop.f32.mrf.mxu0 }
 0x66b   :  { %v1466_v23 = vpop.permute.xlu2 %282 }
 0x66c   :  { %1182 = vmatmul.msk.f32.vlgmr.msra.gmra.mxu3 %vm153_vm6, %v1466_v23 }
 0x66d   :  { %1216 = vmatpush.msra.mxu3 %v599_v17 }
 0x6ef   :  { %v303_v26 = vpop.f32.mrf.mxu3 }
 0x6f0   :  { %v306_v27 = vadd.f32 %v303_v26, %v105_v25  ;;  %v111_v25 = vadd.f32 %v1417_v2, %v110_v24 }
 0x6f2   :  { %1250 = vtanh.f32 %v306_v27  ;;  %v1183_v30 = vmul.f32 -1.442695, %v306_v27 }
 0x6f4   :  { %1252 = vpow2.f32 %v1183_v30 }
 0x6f8   :  { %v1251_v28 = vpop.eup %1250 }
 0x6f9   :  { %329 = vrot.lane.b32.xlu0 %v1251_v28, %s1354_s15 }
 0x6fa   :  { %v1253_v31 = vpop.eup %1252 }
 0x6fb   :  { %v310_v32 = vadd.f32 1.0, %v1253_v31 }
 0x6fd   :  { %1254 = vrcp.f32 %v310_v32  ;;  %v322_v38 = vand.u32 2147483648, %v310_v32  ;;  %vm316_vm0 = vweird.f32 %v310_v32  ;;  %v320_v39 = vand.u32 2147483647, %v310_v32 }
 0x6ff   :  { %v323_v41 = vor.u32 1.1754944e-38, %v322_v38  ;;  %vm321_vm3 = vcmp.eq.f32.partialorder %v320_v39, 8.507059e+37 }
 0x703   :  { %v1255_v33 = vpop.eup %1254 }
 0x704   :  { %v312_v34 = vmul.f32 %v1255_v33, %v310_v32  ;;  %vm317_vm15 = vweird.f32 %v1255_v33 }
 0x705   :  { %vm318_vm2 = vmor %vm316_vm0, %vm317_vm15 }
 0x706   :  { %v313_v35 = vsub.f32 1.0, %v312_v34 }
 0x708   :  { %v314_v36 = vmul.f32 %v1255_v33, %v313_v35 }
 0x70a   :  { %v315_v37 = vadd.f32 %v1255_v33, %v314_v36 }
 0x70c   :  { %v319_v40 = vsel %vm318_vm2, %v1255_v33, %v315_v37 }
 0x70d   :  { %v324_v43 = vsel %vm321_vm3, %v323_v41, %v319_v40 }
 0x70e   :  { %v327_v45 = vmul.f32 %v324_v43, %v274_v18  ;;  %v598_v18 = vld [vmem:[%s1671_s4 + $0x10] sm:$0xff] }
 0x70f   :  { %626 = vmatpush.msra.mxu2 %v598_v18  ;;  %1217 = vmatpush.msra.mxu3 %v598_v18 }
 0x711   :  { %627 = vmatpush.msra.mxu2 %v597_v20  ;;  %1218 = vmatpush.msra.mxu3 %v597_v20 }
 0x713   :  { %628 = vmatpush.msra.mxu2 %v596_v21  ;;  %1219 = vmatpush.msra.mxu3 %v596_v21 }
 0x76b   :  { %v330_v42 = vpop.permute.xlu0 %329 }
 0x76c   :  { %v332_v44 = vmul.f32 %v330_v42, %v324_v43 }
 0x76e   :  { %334 = vrot.lane.b32.xlu1 %v332_v44, %s1355_s1 }
 0x7e0   :  { %v335_v46 = vpop.permute.xlu1 %334 }
 0x7e1   :  { %v337_v47 = vadd.f32 %v335_v46, %v327_v45 }
 0x7e3   :  { %1256 = vtanh.f32 %v337_v47 }
 0x7e9   :  { %v1257_v48 = vpop.eup %1256 }
 0x7ea   :  { %340 = vrot.lane.b32.xlu2 %v1257_v48, %s1354_s15  ;;  %v38_v48 = vld [vmem:[%s1668_s0 + $0x30] sm:$0xff] }
 0x7eb   :  { %1175 = vmatmul.msk.f32.gmra.mxu0 %vm49_vm1, %v38_v48 }
 0x844   :  { %v341_v50 = vpop.permute.xlu2 %340 }
 0x845   :  { %v343_v51 = vmul.f32 %v341_v50, %v324_v43 }
 0x847   :  { %345 = vrot.lane.b32.xlu0 %v343_v51, %s1355_s1 }
 0x868   :  { %v113_v50 = vpop.f32.mrf.mxu0 }
 0x869   :  { %v114_v51 = vadd.f32 %v1417_v2, %v113_v50 }
 0x8b9   :  { %v346_v52 = vpop.permute.xlu0 %345 }
 0x8ba   :  { %1184 = vmatmul.msk.f32.vlgmr.msrb.gmra.mxu1 %vm153_vm6, %v346_v52 }
 0x937   :  { %v366_v55 = vpop.f32.mrf.mxu1 }
 0x938   :  { %v369_v56 = vadd.f32 %v366_v55, %v108_v54 }
 0x93a   :  { %1258 = vtanh.f32 %v369_v56  ;;  %v1185_v59 = vmul.f32 -1.442695, %v369_v56 }
 0x93c   :  { %1260 = vpow2.f32 %v1185_v59 }
 0x940   :  { %v1259_v57 = vpop.eup %1258 }
 0x941   :  { %392 = vrot.lane.b32.xlu1 %v1259_v57, %s1354_s15 }
 0x942   :  { %v1261_v60 = vpop.eup %1260 }
 0x943   :  { %v373_v61 = vadd.f32 1.0, %v1261_v60 }
 0x945   :  { %1262 = vrcp.f32 %v373_v61  ;;  %v385_v4 = vand.u32 2147483648, %v373_v61  ;;  %vm379_vm5 = vweird.f32 %v373_v61  ;;  %v383_v5 = vand.u32 2147483647, %v373_v61 }
 0x947   :  { %v386_v7 = vor.u32 1.1754944e-38, %v385_v4  ;;  %vm384_vm8 = vcmp.eq.f32.partialorder %v383_v5, 8.507059e+37 }
 0x94b   :  { %v1263_v62 = vpop.eup %1262 }
 0x94c   :  { %v375_v63 = vmul.f32 %v1263_v62, %v373_v61  ;;  %vm380_vm4 = vweird.f32 %v1263_v62 }
 0x94d   :  { %vm381_vm7 = vmor %vm379_vm5, %vm380_vm4 }
 0x94e   :  { %v376_v0 = vsub.f32 1.0, %v375_v63 }
 0x950   :  { %v377_v1 = vmul.f32 %v1263_v62, %v376_v0 }
 0x952   :  { %v378_v3 = vadd.f32 %v1263_v62, %v377_v1 }
 0x954   :  { %v382_v6 = vsel %vm381_vm7, %v1263_v62, %v378_v3 }
 0x955   :  { %v387_v9 = vsel %vm384_vm8, %v386_v7, %v382_v6 }
 0x956   :  { %v390_v11 = vmul.f32 %v387_v9, %v337_v47 }
 0x9b3   :  { %v393_v8 = vpop.permute.xlu1 %392 }
 0x9b4   :  { %v395_v10 = vmul.f32 %v393_v8, %v387_v9 }
 0x9b6   :  { %397 = vrot.lane.b32.xlu2 %v395_v10, %s1355_s1 }
 0xa10   :  { %v398_v12 = vpop.permute.xlu2 %397 }
 0xa11   :  { %v400_v13 = vadd.f32 %v398_v12, %v390_v11  ;;  %v39_v12 = vld [vmem:[%s1668_s0 + $0x38] sm:$0xff] }
 0xa12   :  { %1176 = vmatmul.msk.f32.gmra.mxu0 %vm49_vm1, %v39_v12 }
 0xa13   :  { %1264 = vtanh.f32 %v400_v13 }
 0xa19   :  { %v1265_v14 = vpop.eup %1264 }
 0xa1a   :  { %403 = vrot.lane.b32.xlu0 %v1265_v14, %s1354_s15 }
 0xa8c   :  { %v404_v15 = vpop.permute.xlu0 %403 }
 0xa8d   :  { %v406_v16 = vmul.f32 %v404_v15, %v387_v9 }
 0xa8f   :  { %408 = vrot.lane.b32.xlu1 %v406_v16, %s1355_s1  ;;  %v116_v20 = vpop.f32.mrf.mxu0 }
 0xa90   :  { %v117_v21 = vadd.f32 %v1417_v2, %v116_v20 }
 0xb01   :  { %v409_v22 = vpop.permute.xlu1 %408 }
 0xb02   :  { %1186 = vmatmul.msk.f32.vlgmr.msrb.gmra.mxu2 %vm153_vm6, %v409_v22 }
 0xb0a   :  { %1192 = vmatmul.msk.f32.vlgmr.msra.gmra.mxu2 %vm153_vm6, %v1440_v29 }
 0xb12   :  { %1193 = vmatmul.msk.f32.gmra.mxu2 %vm153_vm6, %v1453_v58 }
 0xb1a   :  { %1194 = vmatmul.msk.f32.gmra.mxu2 %vm153_vm6, %v1466_v23 }
 0xb22   :  { %1195 = vmatmul.msk.f32.gmra.mxu2 %vm153_vm6, %v346_v52 }
 0xb2a   :  { %1196 = vmatmul.msk.f32.gmra.mxu2 %vm153_vm6, %v409_v22 }
 0xb85   :  { %v429_v26 = vpop.f32.mrf.mxu2 }
 0xb86   :  { %v432_v27 = vadd.f32 %v429_v26, %v111_v25 }
 0xb88   :  { %1266 = vtanh.f32 %v432_v27  ;;  %v1187_v29 = vmul.f32 -1.442695, %v432_v27 }
 0xb8a   :  { %1268 = vpow2.f32 %v1187_v29 }
 0xb8d   :  { %v630_v14 = vpop.f32.mrf.mxu2 }
 0xb8e   :  { %v1267_v28 = vpop.eup %1266 }
 0xb8f   :  { %455 = vrot.lane.b32.xlu2 %v1267_v28, %s1354_s15 }
 0xb90   :  { %v1269_v30 = vpop.eup %1268 }
 0xb91   :  { %v436_v58 = vadd.f32 1.0, %v1269_v30 }
 0xb93   :  { %1270 = vrcp.f32 %v436_v58  ;;  %v448_v35 = vand.u32 2147483648, %v436_v58  ;;  %vm442_vm10 = vweird.f32 %v436_v58  ;;  %v446_v36 = vand.u32 2147483647, %v436_v58 }
 0xb95   :  { %v449_v38 = vor.u32 1.1754944e-38, %v448_v35  ;;  %vm447_vm12 = vcmp.eq.f32.partialorder %v446_v36, 8.507059e+37 }
 0xb99   :  { %v1271_v31 = vpop.eup %1270 }
 0xb9a   :  { %v438_v23 = vmul.f32 %v1271_v31, %v436_v58  ;;  %vm443_vm9 = vweird.f32 %v1271_v31 }
 0xb9b   :  { %vm444_vm11 = vmor %vm442_vm10, %vm443_vm9 }
 0xb9c   :  { %v439_v32 = vsub.f32 1.0, %v438_v23 }
 0xb9e   :  { %v440_v33 = vmul.f32 %v1271_v31, %v439_v32 }
 0xba0   :  { %v441_v34 = vadd.f32 %v1271_v31, %v440_v33 }
 0xba2   :  { %v445_v37 = vsel %vm444_vm11, %v1271_v31, %v441_v34 }
 0xba3   :  { %v450_v40 = vsel %vm447_vm12, %v449_v38, %v445_v37 }
 0xba4   :  { %v453_v42 = vmul.f32 %v450_v40, %v400_v13  ;;  %v1535_v13 = vld [vmem:[%s1672_s6] ss:$0 sm:$0xff] }
 0xba5   :  { %v631_v15 = vadd.f32 %v1535_v13, %v630_v14 }
 0xba7   :  { %v1200_v26 = vmul.f32 -1.442695, %v631_v15 }
 0xbe9   :  { %v456_v39 = vpop.permute.xlu2 %455 }
 0xbea   :  { %v458_v41 = vmul.f32 %v456_v39, %v450_v40 }
 0xbec   :  { %460 = vrot.lane.b32.xlu0 %v458_v41, %s1355_s1 }
 0xc5e   :  { %v461_v43 = vpop.permute.xlu0 %460 }
 0xc5f   :  { %v463_v44 = vadd.f32 %v461_v43, %v453_v42 }
 0xc61   :  { %1272 = vtanh.f32 %v463_v44 }
 0xc67   :  { %v1273_v45 = vpop.eup %1272 }
 0xc68   :  { %466 = vrot.lane.b32.xlu1 %v1273_v45, %s1354_s15 }
 0xcda   :  { %v467_v46 = vpop.permute.xlu1 %466 }
 0xcdb   :  { %v469_v47 = vmul.f32 %v467_v46, %v450_v40 }
 0xcdd   :  { %471 = vrot.lane.b32.xlu2 %v469_v47, %s1355_s1 }
 0xd37   :  { %v472_v49 = vpop.permute.xlu2 %471 }
 0xd38   :  { %1188 = vmatmul.msk.f32.vlgmr.msrb.gmra.mxu3 %vm153_vm6, %v472_v49  ;;  %1197 = vmatmul.msk.f32.gmra.mxu2 %vm153_vm6, %v472_v49 }
 0xdbb   :  { %v492_v52 = vpop.f32.mrf.mxu3 }
 0xdbc   :  { %v495_v53 = vadd.f32 %v492_v52, %v114_v51 }
 0xdbe   :  { %1274 = vtanh.f32 %v495_v53  ;;  %v1189_v55 = vmul.f32 -1.442695, %v495_v53 }
 0xdc0   :  { %1276 = vpow2.f32 %v1189_v55 }
 0xdc4   :  { %v1275_v54 = vpop.eup %1274 }
 0xdc5   :  { %518 = vrot.lane.b32.xlu0 %v1275_v54, %s1354_s15 }
 0xdc6   :  { %v1277_v56 = vpop.eup %1276 }
 0xdc7   :  { %v499_v57 = vadd.f32 1.0, %v1277_v56 }
 0xdc9   :  { %1278 = vrcp.f32 %v499_v57  ;;  %v511_v0 = vand.u32 2147483648, %v499_v57  ;;  %vm505_vm14 = vweird.f32 %v499_v57  ;;  %v509_v1 = vand.u32 2147483647, %v499_v57 }
 0xdcb   :  { %v512_v4 = vor.u32 1.1754944e-38, %v511_v0  ;;  %vm510_vm0 = vcmp.eq.f32.partialorder %v509_v1, 8.507059e+37  ;;  %v1568_v1 = vld [vmem:[%s1673_s5 + $0x8] sm:$0xff] }
 0xdcf   :  { %v1279_v59 = vpop.eup %1278 }
 0xdd0   :  { %v501_v60 = vmul.f32 %v1279_v59, %v499_v57  ;;  %vm506_vm13 = vweird.f32 %v1279_v59 }
 0xdd1   :  { %vm507_vm15 = vmor %vm505_vm14, %vm506_vm13 }
 0xdd2   :  { %v502_v61 = vsub.f32 1.0, %v501_v60 }
 0xdd4   :  { %v503_v62 = vmul.f32 %v1279_v59, %v502_v61  ;;  %v1552_v61 = vld [vmem:[%s1673_s5 + $0x18] sm:$0xff] }
 0xdd5   :  { %702 = vmatpush.msrb.mxu3 %v1552_v61  ;;  %769 = vmatpush.msrb.mxu1 %v1552_v61 }
 0xdd6   :  { %v504_v63 = vadd.f32 %v1279_v59, %v503_v62  ;;  %v1557_v62 = vld [vmem:[%s1673_s5 + $0x10] sm:$0xff] }
 0xdd7   :  { %703 = vmatpush.msrb.mxu3 %v1557_v62  ;;  %770 = vmatpush.msrb.mxu1 %v1557_v62 }
 0xdd8   :  { %v508_v3 = vsel %vm507_vm15, %v1279_v59, %v504_v63 }
 0xdd9   :  { %v513_v6 = vsel %vm510_vm0, %v512_v4, %v508_v3  ;;  %v1573_v3 = vld [vmem:[%s1673_s5] sm:$0xff]  ;;  %704 = vmatpush.msrb.mxu3 %v1568_v1  ;;  %771 = vmatpush.msrb.mxu1 %v1568_v1 }
 0xdda   :  { %v516_v8 = vmul.f32 %v513_v6, %v463_v44 }
 0xddb   :  { %705 = vmatpush.msrb.mxu3 %v1573_v3  ;;  %772 = vmatpush.msrb.mxu1 %v1573_v3 }
 0xe37   :  { %v519_v5 = vpop.permute.xlu0 %518 }
 0xe38   :  { %v521_v7 = vmul.f32 %v519_v5, %v513_v6 }
 0xe3a   :  { %523 = vrot.lane.b32.xlu1 %v521_v7, %s1355_s1 }
 0xeac   :  { %v524_v9 = vpop.permute.xlu1 %523 }
 0xead   :  { %v1524_v10 = vadd.f32 %v524_v9, %v516_v8  ;;  %v633_v8 = vpop.f32.mrf.mxu2 }
 0xeae   :  { %v634_v9 = vadd.f32 %v1535_v13, %v633_v8 }
 0xeaf   :  { %1280 = vtanh.f32 %v1524_v10 }
 0xeb0   :  { %1282 = vtanh.f32 %v631_v15 }
 0xeb5   :  { %v1281_v11 = vpop.eup %1280 }
 0xeb6   :  { %529 = vrot.lane.b32.xlu2 %v1281_v11, %s1354_s15  ;;  %v1283_v18 = vpop.eup %1282 }
 0xf10   :  { %v530_v16 = vpop.permute.xlu2 %529 }
 0xf11   :  { %v532_v17 = vmul.f32 %v530_v16, %v513_v6 }
 0xf13   :  { %534 = vrot.lane.b32.xlu0 %v532_v17, %s1355_s1 }
 0xf1b   :  { %675 = vrot.lane.b32.xlu0 %v1283_v18, %s1354_s15 }
 0xf85   :  { %v535_v19 = vpop.permute.xlu0 %534 }
 0xf86   :  { %1190 = vmatmul.msk.f32.vlgmr.msra.gmra.mxu1 %vm153_vm6, %v535_v19  ;;  %1198 = vmatmul.msk.f32.vlgmr.msra.gmra.mxu3 %vm153_vm6, %v535_v19 }
 0xf87   :  { %832 = vmatpush.msra.mxu3 %v1552_v61  ;;  %895 = vmatpush.msra.mxu1 %v1552_v61 }
 0xf89   :  { %833 = vmatpush.msra.mxu3 %v1557_v62  ;;  %896 = vmatpush.msra.mxu1 %v1557_v62 }
 0xf8b   :  { %834 = vmatpush.msra.mxu3 %v1568_v1  ;;  %897 = vmatpush.msra.mxu1 %v1568_v1 }
 0xf8d   :  { %v676_v45 = vpop.permute.xlu0 %675  ;;  %835 = vmatpush.msra.mxu3 %v1573_v3  ;;  %898 = vmatpush.msra.mxu1 %v1573_v3 }
0x1003   :  { %v555_v22 = vpop.f32.mrf.mxu1 }
0x1004   :  { %v558_v24 = vadd.f32 %v555_v22, %v117_v21 }
0x1006   :  { %1284 = vtanh.f32 %v558_v24  ;;  %v1191_v27 = vmul.f32 -1.442695, %v558_v24 }
0x1007   :  { %1286 = vpow2.f32 %v1200_v26 }
0x1008   :  { %1288 = vpow2.f32 %v1191_v27 }
0x1009   :  { %v1593_v6 = vpop.f32.mrf.mxu3 }
0x100c   :  { %v1285_v25 = vpop.eup %1284 }
0x100d   :  { %581 = vrot.lane.b32.xlu1 %v1285_v25, %s1354_s15  ;;  %v1287_v28 = vpop.eup %1286 }
0x100e   :  { %v1289_v29 = vpop.eup %1288  ;;  %v657_v30 = vadd.f32 1.0, %v1287_v28 }
0x100f   :  { %v562_v58 = vadd.f32 1.0, %v1289_v29 }
0x1010   :  { %1290 = vrcp.f32 %v657_v30  ;;  %v669_v38 = vand.u32 2147483648, %v657_v30  ;;  %vm663_vm3 = vweird.f32 %v657_v30  ;;  %v667_v40 = vand.u32 2147483647, %v657_v30 }
0x1011   :  { %1292 = vrcp.f32 %v562_v58  ;;  %v574_v41 = vand.u32 2147483648, %v562_v58  ;;  %vm568_vm5 = vweird.f32 %v562_v58  ;;  %v572_v42 = vand.u32 2147483647, %v562_v58 }
0x1012   :  { %v670_v44 = vor.u32 1.1754944e-38, %v669_v38  ;;  %vm668_vm8 = vcmp.eq.f32.partialorder %v667_v40, 8.507059e+37 }
0x1013   :  { %v575_v47 = vor.u32 1.1754944e-38, %v574_v41  ;;  %vm573_vm9 = vcmp.eq.f32.partialorder %v572_v42, 8.507059e+37 }
0x1016   :  { %v1291_v31 = vpop.eup %1290 }
0x1017   :  { %v1293_v23 = vpop.eup %1292  ;;  %v659_v32 = vmul.f32 %v1291_v31, %v657_v30  ;;  %vm664_vm1 = vweird.f32 %v1291_v31 }
0x1018   :  { %v564_v2 = vmul.f32 %v1293_v23, %v562_v58  ;;  %vm569_vm2 = vweird.f32 %v1293_v23  ;;  %vm665_vm4 = vmor %vm663_vm3, %vm664_vm1 }
0x1019   :  { %v660_v33 = vsub.f32 1.0, %v659_v32  ;;  %vm570_vm7 = vmor %vm568_vm5, %vm569_vm2 }
0x101a   :  { %v565_v34 = vsub.f32 1.0, %v564_v2 }
0x101b   :  { %v661_v35 = vmul.f32 %v1291_v31, %v660_v33 }
0x101c   :  { %v566_v36 = vmul.f32 %v1293_v23, %v565_v34 }
0x101d   :  { %v662_v37 = vadd.f32 %v1291_v31, %v661_v35  ;;  %v636_v35 = vpop.f32.mrf.mxu2 }
0x101e   :  { %v567_v39 = vadd.f32 %v1293_v23, %v566_v36  ;;  %v637_v36 = vadd.f32 %v1535_v13, %v636_v35 }
0x101f   :  { %v666_v43 = vsel %vm665_vm4, %v1291_v31, %v662_v37 }
0x1020   :  { %v571_v46 = vsel %vm570_vm7, %v1293_v23, %v567_v39  ;;  %v671_v48 = vsel %vm668_vm8, %v670_v44, %v666_v43 }
0x1021   :  { %v678_v49 = vmul.f32 %v676_v45, %v671_v48  ;;  %v576_v51 = vsel %vm573_vm9, %v575_v47, %v571_v46 }
0x1022   :  { %v579_v54 = vmul.f32 %v576_v51, %v1524_v10 }
0x1023   :  { %1294 = vtanh.f32 %v678_v49 }
0x1029   :  { %v1295_v53 = vpop.eup %1294 }
0x107f   :  { %v582_v50 = vpop.permute.xlu1 %581 }
0x1080   :  { %v584_v52 = vmul.f32 %v582_v50, %v576_v51 }
0x1082   :  { %586 = vrot.lane.b32.xlu2 %v584_v52, %s1355_s1 }
0x108a   :  { %681 = vrot.lane.b32.xlu2 %v1295_v53, %s1356_s3 }
0x10dc   :  { %v587_v55 = vpop.permute.xlu2 %586 }
0x10dd   :  { %v589_v56 = vadd.f32 %v587_v55, %v579_v54 }
0x10df   :  { %1296 = vtanh.f32 %v589_v56 }
0x10e4   :  { %v682_v59 = vpop.permute.xlu2 %681 }
0x10e5   :  { %v1297_v57 = vpop.eup %1296  ;;  %v684_v60 = vmul.f32 %v682_v59, %v671_v48 }
0x10e6   :  { %592 = vrot.lane.b32.xlu1 %v1297_v57, %s1354_s15 }
0x10ee   :  { %686 = vrot.lane.b32.xlu1 %v684_v60, %s1355_s1 }
0x1158   :  { %v593_v63 = vpop.permute.xlu1 %592 }
0x1159   :  { %v595_v0 = vmul.f32 %v593_v63, %v576_v51 }
0x115b   :  { %609 = vrot.lane.b32.xlu0 %v595_v0, %s1355_s1 }
0x1160   :  { %v687_v5 = vpop.permute.xlu1 %686 }
0x1163   :  { %732 = vrot.lane.b32.xlu0 %v678_v49, %s1355_s1 }
0x11cd   :  { %v610_v4 = vpop.permute.xlu0 %609 }
0x11ce   :  { %1199 = vmatmul.msk.f32.gmra.mxu3 %vm153_vm6, %v610_v4  ;;  %v639_v4 = vpop.f32.mrf.mxu2 }
0x11d5   :  { %v733_v30 = vpop.permute.xlu0 %732 }
0x11d6   :  { %1201 = vmatmul.msk.f32.vlgmr.msrb.gmra.mxu3 %vm153_vm6, %v687_v5  ;;  %v640_v5 = vadd.f32 %v1535_v13, %v639_v4 }
0x11d7   :  { %958 = vmatpush.msrb.mxu3 %v1552_v61 }
0x11d9   :  { %959 = vmatpush.msrb.mxu3 %v1557_v62 }
0x11db   :  { %960 = vmatpush.msrb.mxu3 %v1568_v1 }
0x11dd   :  { %961 = vmatpush.msrb.mxu3 %v1573_v3 }
0x1251   :  { %v1595_v7 = vpop.f32.mrf.mxu3 }
0x1259   :  { %v707_v10 = vpop.f32.mrf.mxu3 }
0x125a   :  { %v710_v11 = vadd.f32 %v707_v10, %v634_v9 }
0x125c   :  { %1298 = vtanh.f32 %v710_v11  ;;  %v1202_v14 = vmul.f32 -1.442695, %v710_v11 }
0x125e   :  { %1300 = vpow2.f32 %v1202_v14 }
0x1262   :  { %v1299_v12 = vpop.eup %1298 }
0x1263   :  { %737 = vrot.lane.b32.xlu2 %v1299_v12, %s1354_s15 }
0x1264   :  { %v1301_v15 = vpop.eup %1300 }
0x1265   :  { %v714_v16 = vadd.f32 1.0, %v1301_v15 }
0x1267   :  { %1302 = vrcp.f32 %v714_v16  ;;  %v726_v22 = vand.u32 2147483648, %v714_v16  ;;  %vm720_vm11 = vweird.f32 %v714_v16  ;;  %v724_v24 = vand.u32 2147483647, %v714_v16 }
0x1269   :  { %v727_v26 = vor.u32 1.1754944e-38, %v726_v22  ;;  %vm725_vm13 = vcmp.eq.f32.partialorder %v724_v24, 8.507059e+37 }
0x126d   :  { %v1303_v17 = vpop.eup %1302 }
0x126e   :  { %v716_v18 = vmul.f32 %v1303_v17, %v714_v16  ;;  %vm721_vm10 = vweird.f32 %v1303_v17 }
0x126f   :  { %vm722_vm12 = vmor %vm720_vm11, %vm721_vm10 }
0x1270   :  { %v717_v19 = vsub.f32 1.0, %v716_v18 }
0x1272   :  { %v718_v20 = vmul.f32 %v1303_v17, %v717_v19 }
0x1274   :  { %v719_v21 = vadd.f32 %v1303_v17, %v718_v20 }
0x1276   :  { %v723_v25 = vsel %vm722_vm12, %v1303_v17, %v719_v21 }
0x1277   :  { %v728_v28 = vsel %vm725_vm13, %v727_v26, %v723_v25 }
0x1278   :  { %v735_v58 = vmul.f32 %v733_v30, %v728_v28 }
0x12bd   :  { %v738_v27 = vpop.permute.xlu2 %737 }
0x12be   :  { %v740_v29 = vmul.f32 %v738_v27, %v728_v28 }
0x12c0   :  { %742 = vrot.lane.b32.xlu1 %v740_v29, %s1355_s1 }
0x1332   :  { %v743_v31 = vpop.permute.xlu1 %742 }
0x1333   :  { %v745_v23 = vadd.f32 %v743_v31, %v735_v58  ;;  %v642_v58 = vpop.f32.mrf.mxu2 }
0x1334   :  { %v643_v31 = vadd.f32 %v1535_v13, %v642_v58 }
0x1335   :  { %1304 = vtanh.f32 %v745_v23 }
0x133b   :  { %v1305_v32 = vpop.eup %1304 }
0x133c   :  { %748 = vrot.lane.b32.xlu2 %v1305_v32, %s1354_s15 }
0x1396   :  { %v749_v2 = vpop.permute.xlu2 %748 }
0x1397   :  { %v751_v33 = vmul.f32 %v749_v2, %v728_v28 }
0x1399   :  { %753 = vrot.lane.b32.xlu0 %v751_v33, %s1355_s1 }
0x140b   :  { %v754_v34 = vpop.permute.xlu0 %753 }
0x140c   :  { %1203 = vmatmul.msk.f32.vlgmr.msrb.gmra.mxu1 %vm153_vm6, %v754_v34 }
0x140d   :  { %1021 = vmatpush.msrb.mxu1 %v1552_v61 }
0x140f   :  { %1022 = vmatpush.msrb.mxu1 %v1557_v62 }
0x1411   :  { %1023 = vmatpush.msrb.mxu1 %v1568_v1 }
0x1413   :  { %1024 = vmatpush.msrb.mxu1 %v1573_v3 }
0x1489   :  { %v774_v37 = vpop.f32.mrf.mxu1 }
0x148a   :  { %v777_v38 = vadd.f32 %v774_v37, %v637_v36 }
0x148c   :  { %1306 = vtanh.f32 %v777_v38  ;;  %v1204_v40 = vmul.f32 -1.442695, %v777_v38 }
0x148e   :  { %1308 = vpow2.f32 %v1204_v40 }
0x1492   :  { %v1307_v39 = vpop.eup %1306 }
0x1493   :  { %800 = vrot.lane.b32.xlu1 %v1307_v39, %s1354_s15 }
0x1494   :  { %v1309_v41 = vpop.eup %1308 }
0x1495   :  { %v781_v42 = vadd.f32 1.0, %v1309_v41 }
0x1497   :  { %1310 = vrcp.f32 %v781_v42  ;;  %v793_v48 = vand.u32 2147483648, %v781_v42  ;;  %vm787_vm15 = vweird.f32 %v781_v42  ;;  %v791_v49 = vand.u32 2147483647, %v781_v42 }
0x1499   :  { %v794_v51 = vor.u32 1.1754944e-38, %v793_v48  ;;  %vm792_vm1 = vcmp.eq.f32.partialorder %v791_v49, 8.507059e+37 }
0x149d   :  { %v1311_v43 = vpop.eup %1310 }
0x149e   :  { %v783_v44 = vmul.f32 %v1311_v43, %v781_v42  ;;  %vm788_vm14 = vweird.f32 %v1311_v43 }
0x149f   :  { %vm789_vm0 = vmor %vm787_vm15, %vm788_vm14 }
0x14a0   :  { %v784_v45 = vsub.f32 1.0, %v783_v44 }
0x14a2   :  { %v785_v46 = vmul.f32 %v1311_v43, %v784_v45 }
0x14a4   :  { %v786_v47 = vadd.f32 %v1311_v43, %v785_v46 }
0x14a6   :  { %v790_v50 = vsel %vm789_vm0, %v1311_v43, %v786_v47 }
0x14a7   :  { %v795_v53 = vsel %vm792_vm1, %v794_v51, %v790_v50 }
0x14a8   :  { %v798_v55 = vmul.f32 %v795_v53, %v745_v23 }
0x1505   :  { %v801_v52 = vpop.permute.xlu1 %800 }
0x1506   :  { %v803_v54 = vmul.f32 %v801_v52, %v795_v53 }
0x1508   :  { %805 = vrot.lane.b32.xlu2 %v803_v54, %s1355_s1 }
0x1562   :  { %v806_v56 = vpop.permute.xlu2 %805 }
0x1563   :  { %v808_v57 = vadd.f32 %v806_v56, %v798_v55  ;;  %v645_v55 = vpop.f32.mrf.mxu2 }
0x1564   :  { %v646_v56 = vadd.f32 %v1535_v13, %v645_v55 }
0x1565   :  { %1312 = vtanh.f32 %v808_v57 }
0x156b   :  { %v1313_v59 = vpop.eup %1312 }
0x156c   :  { %811 = vrot.lane.b32.xlu0 %v1313_v59, %s1354_s15 }
0x15de   :  { %v812_v60 = vpop.permute.xlu0 %811 }
0x15df   :  { %v814_v63 = vmul.f32 %v812_v60, %v795_v53 }
0x15e1   :  { %816 = vrot.lane.b32.xlu1 %v814_v63, %s1355_s1 }
0x1653   :  { %v817_v0 = vpop.permute.xlu1 %816 }
0x1654   :  { %1205 = vmatmul.msk.f32.vlgmr.msra.gmra.mxu3 %vm153_vm6, %v817_v0 }
0x1655   :  { %1084 = vmatpush.msra.mxu3 %v1552_v61 }
0x1657   :  { %1085 = vmatpush.msra.mxu3 %v1557_v62 }
0x1659   :  { %1086 = vmatpush.msra.mxu3 %v1568_v1 }
0x165b   :  { %1087 = vmatpush.msra.mxu3 %v1573_v3 }
0x16d7   :  { %v837_v8 = vpop.f32.mrf.mxu3 }
0x16d8   :  { %v840_v9 = vadd.f32 %v837_v8, %v640_v5 }
0x16da   :  { %1314 = vtanh.f32 %v840_v9  ;;  %v1206_v11 = vmul.f32 -1.442695, %v840_v9 }
0x16dc   :  { %1316 = vpow2.f32 %v1206_v11 }
0x16e0   :  { %v1315_v10 = vpop.eup %1314 }
0x16e1   :  { %863 = vrot.lane.b32.xlu2 %v1315_v10, %s1354_s15 }
0x16e2   :  { %v1317_v12 = vpop.eup %1316 }
0x16e3   :  { %v844_v14 = vadd.f32 1.0, %v1317_v12 }
0x16e5   :  { %1318 = vrcp.f32 %v844_v14  ;;  %v856_v3 = vand.u32 2147483648, %v844_v14  ;;  %vm850_vm3 = vweird.f32 %v844_v14  ;;  %v854_v17 = vand.u32 2147483647, %v844_v14 }
0x16e7   :  { %v857_v19 = vor.u32 1.1754944e-38, %v856_v3  ;;  %vm855_vm5 = vcmp.eq.f32.partialorder %v854_v17, 8.507059e+37 }
0x16eb   :  { %v1319_v61 = vpop.eup %1318 }
0x16ec   :  { %v846_v62 = vmul.f32 %v1319_v61, %v844_v14  ;;  %vm851_vm2 = vweird.f32 %v1319_v61 }
0x16ed   :  { %vm852_vm4 = vmor %vm850_vm3, %vm851_vm2 }
0x16ee   :  { %v847_v15 = vsub.f32 1.0, %v846_v62 }
0x16f0   :  { %v848_v1 = vmul.f32 %v1319_v61, %v847_v15 }
0x16f2   :  { %v849_v16 = vadd.f32 %v1319_v61, %v848_v1 }
0x16f4   :  { %v853_v18 = vsel %vm852_vm4, %v1319_v61, %v849_v16 }
0x16f5   :  { %v858_v21 = vsel %vm855_vm5, %v857_v19, %v853_v18 }
0x16f6   :  { %v861_v24 = vmul.f32 %v858_v21, %v808_v57 }
0x173b   :  { %v864_v20 = vpop.permute.xlu2 %863 }
0x173c   :  { %v866_v22 = vmul.f32 %v864_v20, %v858_v21 }
0x173e   :  { %868 = vrot.lane.b32.xlu0 %v866_v22, %s1355_s1 }
0x17b0   :  { %v869_v25 = vpop.permute.xlu0 %868 }
0x17b1   :  { %v871_v26 = vadd.f32 %v869_v25, %v861_v24  ;;  %v649_v24 = vadd.f32 %v1535_v13, %v1593_v6 }
0x17b3   :  { %1320 = vtanh.f32 %v871_v26 }
0x17b9   :  { %v1321_v27 = vpop.eup %1320 }
0x17ba   :  { %874 = vrot.lane.b32.xlu1 %v1321_v27, %s1354_s15 }
0x182c   :  { %v875_v28 = vpop.permute.xlu1 %874 }
0x182d   :  { %v877_v29 = vmul.f32 %v875_v28, %v858_v21 }
0x182f   :  { %879 = vrot.lane.b32.xlu2 %v877_v29, %s1355_s1 }
0x1889   :  { %v880_v30 = vpop.permute.xlu2 %879 }
0x188a   :  { %1207 = vmatmul.msk.f32.vlgmr.msra.gmra.mxu1 %vm153_vm6, %v880_v30 }
0x1907   :  { %v900_v23 = vpop.f32.mrf.mxu1 }
0x1908   :  { %v903_v32 = vadd.f32 %v900_v23, %v643_v31 }
0x190a   :  { %1322 = vtanh.f32 %v903_v32  ;;  %v1208_v33 = vmul.f32 -1.442695, %v903_v32 }
0x190c   :  { %1324 = vpow2.f32 %v1208_v33 }
0x1910   :  { %v1323_v2 = vpop.eup %1322 }
0x1911   :  { %926 = vrot.lane.b32.xlu0 %v1323_v2, %s1354_s15 }
0x1912   :  { %v1325_v34 = vpop.eup %1324 }
0x1913   :  { %v907_v35 = vadd.f32 1.0, %v1325_v34 }
0x1915   :  { %1326 = vrcp.f32 %v907_v35  ;;  %v919_v41 = vand.u32 2147483648, %v907_v35  ;;  %vm913_vm8 = vweird.f32 %v907_v35  ;;  %v917_v42 = vand.u32 2147483647, %v907_v35 }
0x1917   :  { %v920_v44 = vor.u32 1.1754944e-38, %v919_v41  ;;  %vm918_vm10 = vcmp.eq.f32.partialorder %v917_v42, 8.507059e+37 }
0x191b   :  { %v1327_v36 = vpop.eup %1326 }
0x191c   :  { %v909_v37 = vmul.f32 %v1327_v36, %v907_v35  ;;  %vm914_vm7 = vweird.f32 %v1327_v36 }
0x191d   :  { %vm915_vm9 = vmor %vm913_vm8, %vm914_vm7 }
0x191e   :  { %v910_v38 = vsub.f32 1.0, %v909_v37 }
0x1920   :  { %v911_v39 = vmul.f32 %v1327_v36, %v910_v38 }
0x1922   :  { %v912_v40 = vadd.f32 %v1327_v36, %v911_v39 }
0x1924   :  { %v916_v43 = vsel %vm915_vm9, %v1327_v36, %v912_v40 }
0x1925   :  { %v921_v46 = vsel %vm918_vm10, %v920_v44, %v916_v43 }
0x1926   :  { %v924_v48 = vmul.f32 %v921_v46, %v871_v26 }
0x1983   :  { %v927_v45 = vpop.permute.xlu0 %926 }
0x1984   :  { %v929_v47 = vmul.f32 %v927_v45, %v921_v46 }
0x1986   :  { %931 = vrot.lane.b32.xlu1 %v929_v47, %s1355_s1 }
0x19f8   :  { %v932_v49 = vpop.permute.xlu1 %931 }
0x19f9   :  { %v934_v50 = vadd.f32 %v932_v49, %v924_v48 }
0x19fb   :  { %1328 = vtanh.f32 %v934_v50 }
0x1a01   :  { %v1329_v51 = vpop.eup %1328 }
0x1a02   :  { %937 = vrot.lane.b32.xlu2 %v1329_v51, %s1354_s15 }
0x1a5c   :  { %v938_v52 = vpop.permute.xlu2 %937 }
0x1a5d   :  { %v940_v53 = vmul.f32 %v938_v52, %v921_v46  ;;  %v652_v46 = vadd.f32 %v1535_v13, %v1595_v7 }
0x1a5f   :  { %942 = vrot.lane.b32.xlu0 %v940_v53, %s1355_s1 }
0x1ad1   :  { %v943_v54 = vpop.permute.xlu0 %942 }
0x1ad2   :  { %1209 = vmatmul.msk.f32.vlgmr.msrb.gmra.mxu3 %vm153_vm6, %v943_v54 }
0x1b55   :  { %v963_v57 = vpop.f32.mrf.mxu3 }
0x1b56   :  { %v966_v59 = vadd.f32 %v963_v57, %v646_v56 }
0x1b58   :  { %1330 = vtanh.f32 %v966_v59  ;;  %v1210_v63 = vmul.f32 -1.442695, %v966_v59 }
0x1b5a   :  { %1332 = vpow2.f32 %v1210_v63 }
0x1b5e   :  { %v1331_v60 = vpop.eup %1330 }
0x1b5f   :  { %989 = vrot.lane.b32.xlu1 %v1331_v60, %s1354_s15 }
0x1b60   :  { %v1333_v0 = vpop.eup %1332 }
0x1b61   :  { %v970_v4 = vadd.f32 1.0, %v1333_v0 }
0x1b63   :  { %1334 = vrcp.f32 %v970_v4  ;;  %v982_v12 = vand.u32 2147483648, %v970_v4  ;;  %vm976_vm12 = vweird.f32 %v970_v4  ;;  %v980_v14 = vand.u32 2147483647, %v970_v4 }
0x1b65   :  { %v983_v62 = vor.u32 1.1754944e-38, %v982_v12  ;;  %vm981_vm14 = vcmp.eq.f32.partialorder %v980_v14, 8.507059e+37  ;;  %v1132_v12 = vld [vmem:[%s1674_s7 + $0x10] sm:$0xff]  ;;  %v1131_v14 = vld [vmem:[%s1674_s7 + $0x8] sm:$0xff] }
0x1b69   :  { %v1335_v5 = vpop.eup %1334 }
0x1b6a   :  { %v972_v8 = vmul.f32 %v1335_v5, %v970_v4  ;;  %vm977_vm11 = vweird.f32 %v1335_v5 }
0x1b6b   :  { %vm978_vm13 = vmor %vm976_vm12, %vm977_vm11 }
0x1b6c   :  { %v973_v9 = vsub.f32 1.0, %v972_v8 }
0x1b6e   :  { %v974_v10 = vmul.f32 %v1335_v5, %v973_v9 }
0x1b70   :  { %v975_v11 = vadd.f32 %v1335_v5, %v974_v10 }
0x1b72   :  { %v979_v61 = vsel %vm978_vm13, %v1335_v5, %v975_v11  ;;  %v1133_v11 = vld [vmem:[%s1674_s7 + $0x18] sm:$0xff] }
0x1b73   :  { %v984_v1 = vsel %vm981_vm14, %v983_v62, %v979_v61  ;;  %1155 = vmatpush.msra.mxu1 %v1133_v11  ;;  %v1130_v61 = vld [vmem:[%s1674_s7] sm:$0xff] }
0x1b74   :  { %v987_v3 = vmul.f32 %v984_v1, %v934_v50 }
0x1b75   :  { %1156 = vmatpush.msra.mxu1 %v1132_v12 }
0x1b77   :  { %1157 = vmatpush.msra.mxu1 %v1131_v14 }
0x1b79   :  { %1158 = vmatpush.msra.mxu1 %v1130_v61 }
0x1bd1   :  { %v990_v15 = vpop.permute.xlu1 %989 }
0x1bd2   :  { %v992_v16 = vmul.f32 %v990_v15, %v984_v1 }
0x1bd4   :  { %994 = vrot.lane.b32.xlu2 %v992_v16, %s1355_s1  ;;  %v1225_v16 = vld [vmem:[%s1675_s8] ss:$0 sm:$0xff] }
0x1c2e   :  { %v995_v17 = vpop.permute.xlu2 %994 }
0x1c2f   :  { %v997_v18 = vadd.f32 %v995_v17, %v987_v3 }
0x1c31   :  { %1336 = vtanh.f32 %v997_v18 }
0x1c37   :  { %v1337_v19 = vpop.eup %1336 }
0x1c38   :  { %1000 = vrot.lane.b32.xlu0 %v1337_v19, %s1354_s15 }
0x1caa   :  { %v1001_v20 = vpop.permute.xlu0 %1000 }
0x1cab   :  { %v1003_v21 = vmul.f32 %v1001_v20, %v984_v1 }
0x1cad   :  { %1005 = vrot.lane.b32.xlu1 %v1003_v21, %s1355_s1 }
0x1d1f   :  { %v1006_v22 = vpop.permute.xlu1 %1005 }
0x1d20   :  { %1211 = vmatmul.msk.f32.vlgmr.msrb.gmra.mxu1 %vm153_vm6, %v1006_v22 }
0x1d9d   :  { %v1026_v25 = vpop.f32.mrf.mxu1 }
0x1d9e   :  { %v1029_v26 = vadd.f32 %v1026_v25, %v649_v24 }
0x1da0   :  { %1338 = vtanh.f32 %v1029_v26  ;;  %v1212_v28 = vmul.f32 -1.442695, %v1029_v26 }
0x1da2   :  { %1340 = vpow2.f32 %v1212_v28 }
0x1da6   :  { %v1339_v27 = vpop.eup %1338 }
0x1da7   :  { %1052 = vrot.lane.b32.xlu2 %v1339_v27, %s1354_s15 }
0x1da8   :  { %v1341_v29 = vpop.eup %1340 }
0x1da9   :  { %v1033_v30 = vadd.f32 1.0, %v1341_v29 }
0x1dab   :  { %1342 = vrcp.f32 %v1033_v30  ;;  %v1045_v33 = vand.u32 2147483648, %v1033_v30  ;;  %vm1039_vm0 = vweird.f32 %v1033_v30  ;;  %v1043_v6 = vand.u32 2147483647, %v1033_v30 }
0x1dad   :  { %v1046_v35 = vor.u32 1.1754944e-38, %v1045_v33  ;;  %vm1044_vm2 = vcmp.eq.f32.partialorder %v1043_v6, 8.507059e+37 }
0x1db1   :  { %v1343_v58 = vpop.eup %1342 }
0x1db2   :  { %v1035_v31 = vmul.f32 %v1343_v58, %v1033_v30  ;;  %vm1040_vm15 = vweird.f32 %v1343_v58 }
0x1db3   :  { %vm1041_vm1 = vmor %vm1039_vm0, %vm1040_vm15 }
0x1db4   :  { %v1036_v23 = vsub.f32 1.0, %v1035_v31 }
0x1db6   :  { %v1037_v32 = vmul.f32 %v1343_v58, %v1036_v23 }
0x1db8   :  { %v1038_v2 = vadd.f32 %v1343_v58, %v1037_v32 }
0x1dba   :  { %v1042_v34 = vsel %vm1041_vm1, %v1343_v58, %v1038_v2 }
0x1dbb   :  { %v1047_v37 = vsel %vm1044_vm2, %v1046_v35, %v1042_v34 }
0x1dbc   :  { %v1050_v39 = vmul.f32 %v1047_v37, %v997_v18 }
0x1e01   :  { %v1053_v36 = vpop.permute.xlu2 %1052 }
0x1e02   :  { %v1055_v38 = vmul.f32 %v1053_v36, %v1047_v37 }
0x1e04   :  { %1057 = vrot.lane.b32.xlu0 %v1055_v38, %s1355_s1 }
0x1e76   :  { %v1058_v40 = vpop.permute.xlu0 %1057 }
0x1e77   :  { %v1060_v41 = vadd.f32 %v1058_v40, %v1050_v39 }
0x1e79   :  { %1344 = vtanh.f32 %v1060_v41 }
0x1e7f   :  { %v1345_v42 = vpop.eup %1344 }
0x1e80   :  { %1063 = vrot.lane.b32.xlu1 %v1345_v42, %s1354_s15 }
0x1ef2   :  { %v1064_v43 = vpop.permute.xlu1 %1063 }
0x1ef3   :  { %v1066_v44 = vmul.f32 %v1064_v43, %v1047_v37 }
0x1ef5   :  { %1068 = vrot.lane.b32.xlu2 %v1066_v44, %s1355_s1 }
0x1f4f   :  { %v1069_v45 = vpop.permute.xlu2 %1068 }
0x1f50   :  { %1213 = vmatmul.msk.f32.vlgmr.msra.gmra.mxu3 %vm153_vm6, %v1069_v45 }
0x1fd3   :  { %v1089_v47 = vpop.f32.mrf.mxu3 }
0x1fd4   :  { %v1092_v48 = vadd.f32 %v1089_v47, %v652_v46 }
0x1fd6   :  { %1346 = vtanh.f32 %v1092_v48  ;;  %v1214_v50 = vmul.f32 -1.442695, %v1092_v48 }
0x1fd8   :  { %1348 = vpow2.f32 %v1214_v50 }
0x1fdc   :  { %v1347_v49 = vpop.eup %1346 }
0x1fdd   :  { %1115 = vrot.lane.b32.xlu0 %v1347_v49, %s1354_s15 }
0x1fde   :  { %v1349_v51 = vpop.eup %1348 }
0x1fdf   :  { %v1096_v52 = vadd.f32 1.0, %v1349_v51 }
0x1fe1   :  { %1350 = vrcp.f32 %v1096_v52  ;;  %v1108_v59 = vand.u32 2147483648, %v1096_v52  ;;  %vm1102_vm4 = vweird.f32 %v1096_v52  ;;  %v1106_v13 = vand.u32 2147483647, %v1096_v52 }
0x1fe3   :  { %v1109_v60 = vor.u32 1.1754944e-38, %v1108_v59  ;;  %vm1107_vm7 = vcmp.eq.f32.partialorder %v1106_v13, 8.507059e+37 }
0x1fe7   :  { %v1351_v53 = vpop.eup %1350 }
0x1fe8   :  { %v1098_v54 = vmul.f32 %v1351_v53, %v1096_v52  ;;  %vm1103_vm3 = vweird.f32 %v1351_v53 }
0x1fe9   :  { %vm1104_vm5 = vmor %vm1102_vm4, %vm1103_vm3 }
0x1fea   :  { %v1099_v55 = vsub.f32 1.0, %v1098_v54 }
0x1fec   :  { %v1100_v56 = vmul.f32 %v1351_v53, %v1099_v55 }
0x1fee   :  { %v1101_v57 = vadd.f32 %v1351_v53, %v1100_v56 }
0x1ff0   :  { %v1105_v7 = vsel %vm1104_vm5, %v1351_v53, %v1101_v57 }
0x1ff1   :  { %v1110_v0 = vsel %vm1107_vm7, %v1109_v60, %v1105_v7 }
0x1ff2   :  { %v1113_v5 = vmul.f32 %v1110_v0, %v1060_v41 }
0x204f   :  { %v1116_v63 = vpop.permute.xlu0 %1115 }
0x2050   :  { %v1118_v4 = vmul.f32 %v1116_v63, %v1110_v0 }
0x2052   :  { %1120 = vrot.lane.b32.xlu1 %v1118_v4, %s1355_s1 }
0x20c4   :  { %v1121_v8 = vpop.permute.xlu1 %1120 }
0x20c5   :  { %v1123_v9 = vadd.f32 %v1121_v8, %v1113_v5 }
0x20c7   :  { %1352 = vtanh.f32 %v1123_v9 }
0x20cd   :  { %v1353_v10 = vpop.eup %1352 }
0x20ce   :  { %1126 = vrot.lane.b32.xlu2 %v1353_v10, %s1354_s15 }
0x2128   :  { %v1127_v62 = vpop.permute.xlu2 %1126 }
0x2129   :  { %v1129_v15 = vmul.f32 %v1127_v62, %v1110_v0 }
0x212b   :  { %1139 = vrot.lane.b32.xlu0 %v1129_v15, %s1355_s1 }
0x219d   :  { %v1140_v1 = vpop.permute.xlu0 %1139 }
0x219e   :  { %1215 = vmatmul.msk.f32.vlgmr.msra.gmra.mxu1 %vm153_vm6, %v1140_v1 }
0x221b   :  { %v1160_v3 = vpop.f32.mrf.mxu1 }
0x221c   :  { %v1161_v17 = vadd.f32 %v1225_v16, %v1160_v3 }
0x221e   :  { %1163 = vst [vmem:[%s1676_s9] sm:$0xff] %v1161_v17 }

</bundles_post_ra>
